<compile_context>
chip_gen: v6e
topology: v6e:2x2x1
jax: 0.10.0
libtpu: 0.0.40
codegen_flags: <defaults>
</compile_context>

<pallas_src>
import functools

import jax
import jax.numpy as jnp
from jax import lax
from jax.experimental import pallas as pl
from jax.experimental.pallas import tpu as pltpu

_LANES = 128
_SUBLANES = 8


def _round_up(x, m):
    return (x + m - 1) // m * m


def _gru_kernel(src_ref, emb_ref, wih_ref, whh_ref, bih_ref, bhh_ref,
                h_ref, x_ref, gi_ref, *,
                hidden_pad, seq_len, t_tile, has_time_pad, unroll):
    """One tile of `t_tile` timesteps of the GRU recurrence.

    src_ref: (Tp*Bp,)        int32 SMEM  time-major flattened token ids (scalar prefetch)
    emb_ref: (V, E)          f32   VMEM  embedding table (whole, resident)
    wih_ref: (E, Gp)         bf16        fused + lane-aligned input->gate weights [r|z|n]
    whh_ref: (Hp, Gp)        bf16        fused + lane-aligned hidden->gate weights
    bih_ref: (1, Gp)         f32         fused input bias
    bhh_ref: (1, Gp)         f32         fused hidden bias
    h_ref  : (Bp, Hp)        f32         hidden state, resident across the T grid axis
    x_ref  : (t_tile*Bp, E)  f32         scratch: gathered embeddings for this tile
    gi_ref : (t_tile*Bp, Gp) f32         scratch: hoisted input projections
    """
    Hp = hidden_pad
    Bp = h_ref.shape[0]
    Gp = wih_ref.shape[1]
    tile_idx = pl.program_id(0)
    rows = t_tile * Bp

    @pl.when(tile_idx == 0)
    def _():
        h_ref[...] = jnp.zeros_like(h_ref)

    # Fused embedding gather: ids from SMEM, rows from the VMEM-resident table.
    # TODO(synk): for vocabularies too large for VMEM, switch emb_ref to
    #             memory_space=pl.ANY and DMA-gather rows via make_async_copy.
    base = tile_idx * rows

    @pl.loop(0, rows)
    def _(r):
        tok = src_ref[base + r]
        x_ref[pl.ds(r, 1), :] = emb_ref[pl.ds(tok, 1), :]

    # Hoisted input projection: one fused, lane-dense MXU matmul per tile,
    # input bias folded in.
    gi_ref[...] = (
        jnp.dot(x_ref[...].astype(jnp.bfloat16), wih_ref[...],
                preferred_element_type=jnp.float32)
        + bih_ref[...])

    # Hoist the hidden-bias broadcast out of the step loop (JAX does not CSE it).
    bhh_b = jnp.broadcast_to(bhh_ref[...], (Bp, Gp))

    def make_step(masked):
        def step(t, h):
            # One fused (Bp,Hp)@(Hp,Gp) matmul per step.
            # TODO(synk): hold W_hh weight-stationary across the step loop via
            #             pltpu.matmul_push_rhs / matmul_acc_lhs / matmul_pop; for
            #             tiny H (<=64) benchmark a VPU broadcast-FMA path instead.
            gh = jnp.dot(h.astype(jnp.bfloat16), whh_ref[...],
                         preferred_element_type=jnp.float32) + bhh_b
            row0 = pl.multiple_of(t * Bp, Bp)
            gi = gi_ref[pl.ds(row0, Bp), :]                     # (Bp, Gp)
            # Gate slices are 128-lane aligned (each gate padded to Hp).
            r = jax.nn.sigmoid(gi[:, 0 * Hp:1 * Hp] + gh[:, 0 * Hp:1 * Hp])
            z = jax.nn.sigmoid(gi[:, 1 * Hp:2 * Hp] + gh[:, 1 * Hp:2 * Hp])
            n = jnp.tanh(gi[:, 2 * Hp:3 * Hp] + r * gh[:, 2 * Hp:3 * Hp])
            h_new = (1.0 - z) * n + z * h
            if masked:
                t_global = tile_idx * t_tile + t
                h_new = jnp.where(t_global < seq_len, h_new, h)
            return h_new
        return step

    if has_time_pad:
        last = pl.num_programs(0) - 1

        @pl.when(tile_idx != last)
        def _():
            h_ref[...] = lax.fori_loop(0, t_tile, make_step(False), h_ref[...],
                                       unroll=unroll)

        @pl.when(tile_idx == last)
        def _():
            h_ref[...] = lax.fori_loop(0, t_tile, make_step(True), h_ref[...],
                                       unroll=unroll)
    else:
        h_ref[...] = lax.fori_loop(0, t_tile, make_step(False), h_ref[...],
                                   unroll=unroll)


def prepare_encoder_params(emb_table, weight_ih, weight_hh, bias_ih, bias_hh):
    """One-time (init-time) fusion / padding / casting of Encoder parameters.

    weight_ih: (3H, E), weight_hh: (3H, H), bias_*: (3H,) -- torch nn.GRU layout,
    gate order [r, z, n].  Each gate is placed at a 128-lane-aligned offset of the
    fused output dim so per-step gate slices are whole-vreg operands.
    """
    E = emb_table.shape[1]
    H = weight_hh.shape[1]
    Hp = _round_up(H, _LANES)
    Gp = 3 * Hp

    def fuse_weight(w, k_pad):            # w: (3H, K) -> (k_pad, Gp) bf16
        wt = w.T                          # (K, 3H)
        out = jnp.zeros((k_pad, Gp), jnp.float32)
        for g in range(3):
            out = out.at[:wt.shape[0], g * Hp:g * Hp + H].set(wt[:, g * H:(g + 1) * H])
        return out.astype(jnp.bfloat16)

    def fuse_bias(b):
        out = jnp.zeros((1, Gp), jnp.float32)
        for g in range(3):
            out = out.at[0, g * Hp:g * Hp + H].set(b[g * H:(g + 1) * H])
        return out

    return {
        "emb": emb_table.astype(jnp.float32),
        "w_ih": fuse_weight(weight_ih, E),        # (E, Gp)
        "w_hh": fuse_weight(weight_hh, Hp),       # (Hp, Gp), zero rows for H..Hp
        "b_ih": fuse_bias(bias_ih),               # (1, Gp)
        "b_hh": fuse_bias(bias_hh),               # (1, Gp)
    }


def _pick_t_tile(T, Bp, E, Hp, Gp, V, vmem_budget_bytes=24 * 1024 * 1024):
    """Largest T-tile whose working set fits a conservative VMEM budget
    (v7x: 64 MiB physical; v5e: 16 MiB default scoped limit, raised below)."""
    fixed = (V * E * 4                     # embedding table, VMEM-resident
             + 2 * (E + Hp) * Gp * 2       # bf16 weights (x2 buffers, conservative)
             + 2 * 2 * Gp * 4              # biases
             + 2 * Bp * Hp * 4)            # resident hidden state
    per_t = Bp * (E * 4 + Gp * 4)          # x scratch + gi scratch per timestep
    t_max = max(1, (vmem_budget_bytes - fixed) // per_t)
    return int(max(1, min(T, 128, t_max)))


def encoder_forward(src, params, *, hidden_dim, t_tile=None):
    """Pallas equivalent of Encoder.forward: returns hidden of shape (1, B, H)."""
    B, T = src.shape
    emb = params["emb"]
    w_ih_f = params["w_ih"]
    w_hh_f = params["w_hh"]
    b_ih_f = params["b_ih"]
    b_hh_f = params["b_hh"]
    V, E = emb.shape
    H = hidden_dim
    Hp, Gp = w_hh_f.shape

    Bp = _round_up(B, _SUBLANES)
    if t_tile is None:
        t_tile = _pick_t_tile(T, Bp, E, Hp, Gp, V)
    Tp = _round_up(T, t_tile)
    n_tiles = Tp // t_tile
    has_time_pad = Tp != T

    # Only the (tiny) token ids are laid out time-major in the wrapper; the
    # embedding activations never touch HBM (gathered in-kernel).
    src_tm = jnp.zeros((Tp, Bp), jnp.int32).at[:T, :B].set(src.T.astype(jnp.int32))
    src_flat = src_tm.reshape(Tp * Bp)

    kernel = functools.partial(
        _gru_kernel, hidden_pad=Hp, seq_len=T, t_tile=t_tile,
        has_time_pad=has_time_pad, unroll=int(max(1, min(t_tile, 8))))

    est_bytes = (V * E * 4 + 2 * (E + Hp) * Gp * 2 + 4 * Gp * 4
                 + 2 * Bp * Hp * 4 + t_tile * Bp * (E + Gp) * 4)
    vmem_limit = int(min(60 * 1024 * 1024, max(16 * 1024 * 1024, 4 * est_bytes)))

    h_final = pl.pallas_call(
        kernel,
        out_shape=jax.ShapeDtypeStruct((Bp, Hp), jnp.float32),
        grid_spec=pltpu.PrefetchScalarGridSpec(
            num_scalar_prefetch=1,               # token ids -> SMEM
            grid=(n_tiles,),
            in_specs=[
                # TODO(synk): pipeline_mode=pl.Buffered(1) on these loop-invariant
                #             operands to single-buffer them (extra VMEM headroom).
                pl.BlockSpec((V, E), lambda i, ids: (0, 0)),      # embedding table
                pl.BlockSpec((E, Gp), lambda i, ids: (0, 0)),     # W_ih fused
                pl.BlockSpec((Hp, Gp), lambda i, ids: (0, 0)),    # W_hh fused
                pl.BlockSpec((1, Gp), lambda i, ids: (0, 0)),     # b_ih
                pl.BlockSpec((1, Gp), lambda i, ids: (0, 0)),     # b_hh
            ],
            out_specs=pl.BlockSpec((Bp, Hp), lambda i, ids: (0, 0)),  # h resident
            scratch_shapes=[
                pltpu.VMEM((t_tile * Bp, E), jnp.float32),    # gathered x tile
                pltpu.VMEM((t_tile * Bp, Gp), jnp.float32),   # input projections
                # TODO(synk): bf16 gi scratch for very large H on v7x (64 MiB VMEM).
            ],
        ),
        compiler_params=pltpu.CompilerParams(
            dimension_semantics=("arbitrary",),   # recurrence: T is sequential
            vmem_limit_bytes=vmem_limit,
        ),
        # TODO(synk): add a leading "parallel" batch grid axis to use v7x's second
        #             TensorCore when B is large (neutral on v5e/v6e).
    )(src_flat, emb, w_ih_f, w_hh_f, b_ih_f, b_hh_f)

    return h_final[None, :B, :H]                  # (1, B, H) like torch hidden


def encoder_reference(src, emb_table, weight_ih, weight_hh, bias_ih, bias_hh):
    """Pure-JAX reference with the same bf16-matmul / f32-gating numerics."""
    H = weight_hh.shape[1]
    x = jnp.take(emb_table, src.T, axis=0).astype(jnp.bfloat16)   # (T, B, E)
    w_ih_t = weight_ih.T.astype(jnp.bfloat16)                     # (E, 3H)
    w_hh_t = weight_hh.T.astype(jnp.bfloat16)                     # (H, 3H)

    def step(h, x_t):
        gi = jnp.dot(x_t, w_ih_t, preferred_element_type=jnp.float32) + bias_ih
        gh = jnp.dot(h.astype(jnp.bfloat16), w_hh_t,
                     preferred_element_type=jnp.float32) + bias_hh
        r = jax.nn.sigmoid(gi[:, 0 * H:1 * H] + gh[:, 0 * H:1 * H])
        z = jax.nn.sigmoid(gi[:, 1 * H:2 * H] + gh[:, 1 * H:2 * H])
        n = jnp.tanh(gi[:, 2 * H:3 * H] + r * gh[:, 2 * H:3 * H])
        return (1.0 - z) * n + z * h, None

    h0 = jnp.zeros((src.shape[0], H), jnp.float32)
    h_fin, _ = lax.scan(step, h0, x)
    return h_fin[None]


if __name__ == "__main__":
    VOCAB, EMB, HID = 50, 32, 32
    B, T = 2, 8

    key = jax.random.PRNGKey(0)
    k_emb, k_wih, k_whh, k_bih, k_bhh, k_src = jax.random.split(key, 6)

    # Embedding ~ N(0,1), padding_idx=0 row zeroed (matches nn.Embedding).
    emb_table = jax.random.normal(k_emb, (VOCAB, EMB), jnp.float32)
    emb_table = emb_table.at[0].set(0.0)

    # GRU params ~ U(-1/sqrt(H), 1/sqrt(H)), torch layout, gate order [r, z, n].
    bound = 1.0 / (HID ** 0.5)
    weight_ih = jax.random.uniform(k_wih, (3 * HID, EMB), jnp.float32, -bound, bound)
    weight_hh = jax.random.uniform(k_whh, (3 * HID, HID), jnp.float32, -bound, bound)
    bias_ih = jax.random.uniform(k_bih, (3 * HID,), jnp.float32, -bound, bound)
    bias_hh = jax.random.uniform(k_bhh, (3 * HID,), jnp.float32, -bound, bound)

    # Token ids (includes some padding-index-0 tokens).
    src = jax.random.randint(k_src, (B, T), 0, VOCAB, jnp.int32)

    # One-time parameter fusion / padding (hoisted out of the forward path).
    params = prepare_encoder_params(emb_table, weight_ih, weight_hh, bias_ih, bias_hh)

    fwd = jax.jit(functools.partial(encoder_forward, hidden_dim=HID))
    hidden = jax.block_until_ready(fwd(src, params))

    ref = encoder_reference(src, emb_table, weight_ih, weight_hh, bias_ih, bias_hh)
    assert hidden.shape == (1, B, HID), hidden.shape
    err = float(jnp.max(jnp.abs(hidden - ref)))
    assert jnp.allclose(hidden, ref, atol=1e-4, rtol=1e-4), (
        f"mismatch vs reference, max_abs_err={err}")

    print("KERNEL_OK")
</pallas_src>

<mosaic_0001>
module attributes {stable_mosaic.version = 11 : i64} {
  func.func @_gru_kernel(%arg0: i32, %arg1: memref<64xi32, #tpu.memory_space<smem>>, %arg2: memref<50x32xf32, #tpu.memory_space<vmem>>, %arg3: memref<32x384xbf16, #tpu.memory_space<vmem>>, %arg4: memref<128x384xbf16, #tpu.memory_space<vmem>>, %arg5: memref<1x384xf32, #tpu.memory_space<vmem>>, %arg6: memref<1x384xf32, #tpu.memory_space<vmem>>, %arg7: memref<8x128xf32, #tpu.memory_space<vmem>>, %arg8: memref<64x32xf32, #tpu.memory_space<vmem>>, %arg9: memref<64x384xf32, #tpu.memory_space<vmem>>) attributes {dimension_semantics = [#tpu.dimension_semantics<arbitrary>], iteration_bounds = array<i64: 1>, scalar_prefetch = 1 : i64, scratch_operands = 2 : i64, tpu.core_type = #tpu.core_type<tc>, window_params = [{pipeline_mode = #tpu.pipeline_mode<synchronous>, transform_indices = @transform_0, window_bounds = array<i64: 50, 32>}, {pipeline_mode = #tpu.pipeline_mode<synchronous>, transform_indices = @transform_1, window_bounds = array<i64: 32, 384>}, {pipeline_mode = #tpu.pipeline_mode<synchronous>, transform_indices = @transform_2, window_bounds = array<i64: 128, 384>}, {pipeline_mode = #tpu.pipeline_mode<synchronous>, transform_indices = @transform_3, window_bounds = array<i64: 1, 384>}, {pipeline_mode = #tpu.pipeline_mode<synchronous>, transform_indices = @transform_4, window_bounds = array<i64: 1, 384>}, {pipeline_mode = #tpu.pipeline_mode<synchronous>, transform_indices = @transform_5, window_bounds = array<i64: 8, 128>}]} {
    %c0_i32 = arith.constant 0 : i32
    %0 = arith.cmpi eq, %arg0, %c0_i32 : i32
    %1 = arith.extui %0 : i1 to i32
    %c0_i32_0 = arith.constant 0 : i32
    %2 = arith.cmpi ne, %1, %c0_i32_0 : i32
    scf.if %2 {
      %cst_83 = arith.constant 0.000000e+00 : f32
      %290 = vector.broadcast %cst_83 : f32 to vector<8x128xf32>
      %c0_84 = arith.constant 0 : index
      %c0_85 = arith.constant 0 : index
      %291 = vector.load %arg7[%c0_84, %c0_85] : memref<8x128xf32, #tpu.memory_space<vmem>>, vector<8x128xf32>
      tpu.vector_store %arg7[%c0_84, %c0_85], %290 {strides = array<i32>} : memref<8x128xf32, #tpu.memory_space<vmem>>, vector<8x128xf32>,
    } else {
    }
    %c64_i32 = arith.constant 64 : i32
    %3 = arith.muli %arg0, %c64_i32 : i32
    %c0_i32_1 = arith.constant 0 : i32
    %c64_i32_2 = arith.constant 64 : i32
    %4 = arith.addi %c0_i32_1, %c64_i32_2 : i32
    %c1_i32 = arith.constant 1 : i32
    scf.for %arg10 = %c0_i32_1 to %4 step %c1_i32  : i32 {
      %c1_i32_83 = arith.constant 1 : i32
      %290 = arith.muli %arg10, %c1_i32_83 : i32
      %c0_i32_84 = arith.constant 0 : i32
      %291 = arith.addi %c0_i32_84, %290 : i32
      %292 = arith.addi %3, %291 : i32
      %293 = arith.index_cast %292 : i32 to index
      %294 = memref.load %arg1[%293] : memref<64xi32, #tpu.memory_space<smem>>
      %295 = arith.index_cast %294 : i32 to index
      %c0_85 = arith.constant 0 : index
      %296 = vector.load %arg2[%295, %c0_85] : memref<50x32xf32, #tpu.memory_space<vmem>>, vector<1x32xf32>
      %297 = arith.index_cast %291 : i32 to index
      %c0_86 = arith.constant 0 : index
      %298 = vector.load %arg8[%297, %c0_86] : memref<64x32xf32, #tpu.memory_space<vmem>>, vector<1x32xf32>
      tpu.vector_store %arg8[%297, %c0_86], %296 {strides = array<i32>} : memref<64x32xf32, #tpu.memory_space<vmem>>, vector<1x32xf32>,
    }
    %c64_i32_3 = arith.constant 64 : i32
    %c0 = arith.constant 0 : index
    %c0_4 = arith.constant 0 : index
    %5 = vector.load %arg8[%c0, %c0_4] : memref<64x32xf32, #tpu.memory_space<vmem>>, vector<64x32xf32>
    %6 = arith.truncf %5 : vector<64x32xf32> to vector<64x32xbf16>
    %c0_5 = arith.constant 0 : index
    %c0_6 = arith.constant 0 : index
    %7 = vector.load %arg3[%c0_5, %c0_6] : memref<32x384xbf16, #tpu.memory_space<vmem>>, vector<32x384xbf16>
    %cst = arith.constant dense<0.000000e+00> : vector<64x384xf32>
    %8 = tpu.matmul %6, %7, %cst {dimension_numbers = #tpu.dot_dimension_numbers<[1], [0], [0], [1], [0, 0, 1, 1], [], []>} : vector<64x32xbf16>, vector<32x384xbf16>, vector<64x384xf32> -> vector<64x384xf32>
    %c0_7 = arith.constant 0 : index
    %c0_8 = arith.constant 0 : index
    %9 = vector.load %arg5[%c0_7, %c0_8] : memref<1x384xf32, #tpu.memory_space<vmem>>, vector<1x384xf32>
    %10 = vector.broadcast %9 : vector<1x384xf32> to vector<64x384xf32>
    %11 = arith.addf %8, %10 : vector<64x384xf32>
    %c0_9 = arith.constant 0 : index
    %c0_10 = arith.constant 0 : index
    %12 = vector.load %arg9[%c0_9, %c0_10] : memref<64x384xf32, #tpu.memory_space<vmem>>, vector<64x384xf32>
    tpu.vector_store %arg9[%c0_9, %c0_10], %11 {strides = array<i32>} : memref<64x384xf32, #tpu.memory_space<vmem>>, vector<64x384xf32>,
    %c0_11 = arith.constant 0 : index
    %c0_12 = arith.constant 0 : index
    %13 = vector.load %arg6[%c0_11, %c0_12] : memref<1x384xf32, #tpu.memory_space<vmem>>, vector<1x384xf32>
    %14 = vector.shape_cast %13 : vector<1x384xf32> to vector<1x384xf32>
    %15 = vector.broadcast %14 : vector<1x384xf32> to vector<8x384xf32>
    %c0_13 = arith.constant 0 : index
    %c0_14 = arith.constant 0 : index
    %16 = vector.load %arg7[%c0_13, %c0_14] : memref<8x128xf32, #tpu.memory_space<vmem>>, vector<8x128xf32>
    %c0_i32_15 = arith.constant 0 : i32
    %17 = arith.truncf %16 : vector<8x128xf32> to vector<8x128xbf16>
    %c0_16 = arith.constant 0 : index
    %c0_17 = arith.constant 0 : index
    %18 = vector.load %arg4[%c0_16, %c0_17] : memref<128x384xbf16, #tpu.memory_space<vmem>>, vector<128x384xbf16>
    %cst_18 = arith.constant dense<0.000000e+00> : vector<8x384xf32>
    %19 = tpu.matmul %17, %18, %cst_18 {dimension_numbers = #tpu.dot_dimension_numbers<[1], [0], [0], [1], [0, 0, 1, 1], [], []>} : vector<8x128xbf16>, vector<128x384xbf16>, vector<8x384xf32> -> vector<8x384xf32>
    %20 = arith.addf %19, %15 : vector<8x384xf32>
    %c8_i32 = arith.constant 8 : i32
    %21 = arith.muli %c0_i32_15, %c8_i32 : i32
    %22 = tpu.assume_multiple %21, 8 : i32
    %23 = arith.index_cast %22 : i32 to index
    %c0_19 = arith.constant 0 : index
    %24 = vector.load %arg9[%23, %c0_19] : memref<64x384xf32, #tpu.memory_space<vmem>>, vector<8x384xf32>
    %25 = vector.extract_strided_slice %24 {offsets = [0, 0], sizes = [8, 128], strides = [1, 1]} : vector<8x384xf32> to vector<8x128xf32>
    %26 = vector.extract_strided_slice %20 {offsets = [0, 0], sizes = [8, 128], strides = [1, 1]} : vector<8x384xf32> to vector<8x128xf32>
    %27 = arith.addf %25, %26 : vector<8x128xf32>
    %28 = arith.negf %27 : vector<8x128xf32>
    %29 = math.exp %28 : vector<8x128xf32>
    %cst_20 = arith.constant 1.000000e+00 : f32
    %30 = vector.broadcast %cst_20 : f32 to vector<8x128xf32>
    %31 = arith.addf %30, %29 : vector<8x128xf32>
    %32 = arith.divf %30, %31 : vector<8x128xf32>
    %33 = vector.extract_strided_slice %24 {offsets = [0, 128], sizes = [8, 128], strides = [1, 1]} : vector<8x384xf32> to vector<8x128xf32>
    %34 = vector.extract_strided_slice %20 {offsets = [0, 128], sizes = [8, 128], strides = [1, 1]} : vector<8x384xf32> to vector<8x128xf32>
    %35 = arith.addf %33, %34 : vector<8x128xf32>
    %36 = arith.negf %35 : vector<8x128xf32>
    %37 = math.exp %36 : vector<8x128xf32>
    %cst_21 = arith.constant 1.000000e+00 : f32
    %38 = vector.broadcast %cst_21 : f32 to vector<8x128xf32>
    %39 = arith.addf %38, %37 : vector<8x128xf32>
    %40 = arith.divf %38, %39 : vector<8x128xf32>
    %41 = vector.extract_strided_slice %24 {offsets = [0, 256], sizes = [8, 128], strides = [1, 1]} : vector<8x384xf32> to vector<8x128xf32>
    %42 = vector.extract_strided_slice %20 {offsets = [0, 256], sizes = [8, 128], strides = [1, 1]} : vector<8x384xf32> to vector<8x128xf32>
    %43 = arith.mulf %32, %42 : vector<8x128xf32>
    %44 = arith.addf %41, %43 : vector<8x128xf32>
    %45 = math.tanh %44 : vector<8x128xf32>
    %cst_22 = arith.constant 1.000000e+00 : f32
    %46 = vector.broadcast %cst_22 : f32 to vector<8x128xf32>
    %47 = arith.subf %46, %40 : vector<8x128xf32>
    %48 = arith.mulf %47, %45 : vector<8x128xf32>
    %49 = arith.mulf %40, %16 : vector<8x128xf32>
    %50 = arith.addf %48, %49 : vector<8x128xf32>
    %c1_i32_23 = arith.constant 1 : i32
    %51 = arith.truncf %50 : vector<8x128xf32> to vector<8x128xbf16>
    %c0_24 = arith.constant 0 : index
    %c0_25 = arith.constant 0 : index
    %52 = vector.load %arg4[%c0_24, %c0_25] : memref<128x384xbf16, #tpu.memory_space<vmem>>, vector<128x384xbf16>
    %cst_26 = arith.constant dense<0.000000e+00> : vector<8x384xf32>
    %53 = tpu.matmul %51, %52, %cst_26 {dimension_numbers = #tpu.dot_dimension_numbers<[1], [0], [0], [1], [0, 0, 1, 1], [], []>} : vector<8x128xbf16>, vector<128x384xbf16>, vector<8x384xf32> -> vector<8x384xf32>
    %54 = arith.addf %53, %15 : vector<8x384xf32>
    %c8_i32_27 = arith.constant 8 : i32
    %55 = arith.muli %c1_i32_23, %c8_i32_27 : i32
    %56 = tpu.assume_multiple %55, 8 : i32
    %57 = arith.index_cast %56 : i32 to index
    %c0_28 = arith.constant 0 : index
    %58 = vector.load %arg9[%57, %c0_28] : memref<64x384xf32, #tpu.memory_space<vmem>>, vector<8x384xf32>
    %59 = vector.extract_strided_slice %58 {offsets = [0, 0], sizes = [8, 128], strides = [1, 1]} : vector<8x384xf32> to vector<8x128xf32>
    %60 = vector.extract_strided_slice %54 {offsets = [0, 0], sizes = [8, 128], strides = [1, 1]} : vector<8x384xf32> to vector<8x128xf32>
    %61 = arith.addf %59, %60 : vector<8x128xf32>
    %62 = arith.negf %61 : vector<8x128xf32>
    %63 = math.exp %62 : vector<8x128xf32>
    %cst_29 = arith.constant 1.000000e+00 : f32
    %64 = vector.broadcast %cst_29 : f32 to vector<8x128xf32>
    %65 = arith.addf %64, %63 : vector<8x128xf32>
    %66 = arith.divf %64, %65 : vector<8x128xf32>
    %67 = vector.extract_strided_slice %58 {offsets = [0, 128], sizes = [8, 128], strides = [1, 1]} : vector<8x384xf32> to vector<8x128xf32>
    %68 = vector.extract_strided_slice %54 {offsets = [0, 128], sizes = [8, 128], strides = [1, 1]} : vector<8x384xf32> to vector<8x128xf32>
    %69 = arith.addf %67, %68 : vector<8x128xf32>
    %70 = arith.negf %69 : vector<8x128xf32>
    %71 = math.exp %70 : vector<8x128xf32>
    %cst_30 = arith.constant 1.000000e+00 : f32
    %72 = vector.broadcast %cst_30 : f32 to vector<8x128xf32>
    %73 = arith.addf %72, %71 : vector<8x128xf32>
    %74 = arith.divf %72, %73 : vector<8x128xf32>
    %75 = vector.extract_strided_slice %58 {offsets = [0, 256], sizes = [8, 128], strides = [1, 1]} : vector<8x384xf32> to vector<8x128xf32>
    %76 = vector.extract_strided_slice %54 {offsets = [0, 256], sizes = [8, 128], strides = [1, 1]} : vector<8x384xf32> to vector<8x128xf32>
    %77 = arith.mulf %66, %76 : vector<8x128xf32>
    %78 = arith.addf %75, %77 : vector<8x128xf32>
    %79 = math.tanh %78 : vector<8x128xf32>
    %cst_31 = arith.constant 1.000000e+00 : f32
    %80 = vector.broadcast %cst_31 : f32 to vector<8x128xf32>
    %81 = arith.subf %80, %74 : vector<8x128xf32>
    %82 = arith.mulf %81, %79 : vector<8x128xf32>
    %83 = arith.mulf %74, %50 : vector<8x128xf32>
    %84 = arith.addf %82, %83 : vector<8x128xf32>
    %c2_i32 = arith.constant 2 : i32
    %85 = arith.truncf %84 : vector<8x128xf32> to vector<8x128xbf16>
    %c0_32 = arith.constant 0 : index
    %c0_33 = arith.constant 0 : index
    %86 = vector.load %arg4[%c0_32, %c0_33] : memref<128x384xbf16, #tpu.memory_space<vmem>>, vector<128x384xbf16>
    %cst_34 = arith.constant dense<0.000000e+00> : vector<8x384xf32>
    %87 = tpu.matmul %85, %86, %cst_34 {dimension_numbers = #tpu.dot_dimension_numbers<[1], [0], [0], [1], [0, 0, 1, 1], [], []>} : vector<8x128xbf16>, vector<128x384xbf16>, vector<8x384xf32> -> vector<8x384xf32>
    %88 = arith.addf %87, %15 : vector<8x384xf32>
    %c8_i32_35 = arith.constant 8 : i32
    %89 = arith.muli %c2_i32, %c8_i32_35 : i32
    %90 = tpu.assume_multiple %89, 8 : i32
    %91 = arith.index_cast %90 : i32 to index
    %c0_36 = arith.constant 0 : index
    %92 = vector.load %arg9[%91, %c0_36] : memref<64x384xf32, #tpu.memory_space<vmem>>, vector<8x384xf32>
    %93 = vector.extract_strided_slice %92 {offsets = [0, 0], sizes = [8, 128], strides = [1, 1]} : vector<8x384xf32> to vector<8x128xf32>
    %94 = vector.extract_strided_slice %88 {offsets = [0, 0], sizes = [8, 128], strides = [1, 1]} : vector<8x384xf32> to vector<8x128xf32>
    %95 = arith.addf %93, %94 : vector<8x128xf32>
    %96 = arith.negf %95 : vector<8x128xf32>
    %97 = math.exp %96 : vector<8x128xf32>
    %cst_37 = arith.constant 1.000000e+00 : f32
    %98 = vector.broadcast %cst_37 : f32 to vector<8x128xf32>
    %99 = arith.addf %98, %97 : vector<8x128xf32>
    %100 = arith.divf %98, %99 : vector<8x128xf32>
    %101 = vector.extract_strided_slice %92 {offsets = [0, 128], sizes = [8, 128], strides = [1, 1]} : vector<8x384xf32> to vector<8x128xf32>
    %102 = vector.extract_strided_slice %88 {offsets = [0, 128], sizes = [8, 128], strides = [1, 1]} : vector<8x384xf32> to vector<8x128xf32>
    %103 = arith.addf %101, %102 : vector<8x128xf32>
    %104 = arith.negf %103 : vector<8x128xf32>
    %105 = math.exp %104 : vector<8x128xf32>
    %cst_38 = arith.constant 1.000000e+00 : f32
    %106 = vector.broadcast %cst_38 : f32 to vector<8x128xf32>
    %107 = arith.addf %106, %105 : vector<8x128xf32>
    %108 = arith.divf %106, %107 : vector<8x128xf32>
    %109 = vector.extract_strided_slice %92 {offsets = [0, 256], sizes = [8, 128], strides = [1, 1]} : vector<8x384xf32> to vector<8x128xf32>
    %110 = vector.extract_strided_slice %88 {offsets = [0, 256], sizes = [8, 128], strides = [1, 1]} : vector<8x384xf32> to vector<8x128xf32>
    %111 = arith.mulf %100, %110 : vector<8x128xf32>
    %112 = arith.addf %109, %111 : vector<8x128xf32>
    %113 = math.tanh %112 : vector<8x128xf32>
    %cst_39 = arith.constant 1.000000e+00 : f32
    %114 = vector.broadcast %cst_39 : f32 to vector<8x128xf32>
    %115 = arith.subf %114, %108 : vector<8x128xf32>
    %116 = arith.mulf %115, %113 : vector<8x128xf32>
    %117 = arith.mulf %108, %84 : vector<8x128xf32>
    %118 = arith.addf %116, %117 : vector<8x128xf32>
    %c3_i32 = arith.constant 3 : i32
    %119 = arith.truncf %118 : vector<8x128xf32> to vector<8x128xbf16>
    %c0_40 = arith.constant 0 : index
    %c0_41 = arith.constant 0 : index
    %120 = vector.load %arg4[%c0_40, %c0_41] : memref<128x384xbf16, #tpu.memory_space<vmem>>, vector<128x384xbf16>
    %cst_42 = arith.constant dense<0.000000e+00> : vector<8x384xf32>
    %121 = tpu.matmul %119, %120, %cst_42 {dimension_numbers = #tpu.dot_dimension_numbers<[1], [0], [0], [1], [0, 0, 1, 1], [], []>} : vector<8x128xbf16>, vector<128x384xbf16>, vector<8x384xf32> -> vector<8x384xf32>
    %122 = arith.addf %121, %15 : vector<8x384xf32>
    %c8_i32_43 = arith.constant 8 : i32
    %123 = arith.muli %c3_i32, %c8_i32_43 : i32
    %124 = tpu.assume_multiple %123, 8 : i32
    %125 = arith.index_cast %124 : i32 to index
    %c0_44 = arith.constant 0 : index
    %126 = vector.load %arg9[%125, %c0_44] : memref<64x384xf32, #tpu.memory_space<vmem>>, vector<8x384xf32>
    %127 = vector.extract_strided_slice %126 {offsets = [0, 0], sizes = [8, 128], strides = [1, 1]} : vector<8x384xf32> to vector<8x128xf32>
    %128 = vector.extract_strided_slice %122 {offsets = [0, 0], sizes = [8, 128], strides = [1, 1]} : vector<8x384xf32> to vector<8x128xf32>
    %129 = arith.addf %127, %128 : vector<8x128xf32>
    %130 = arith.negf %129 : vector<8x128xf32>
    %131 = math.exp %130 : vector<8x128xf32>
    %cst_45 = arith.constant 1.000000e+00 : f32
    %132 = vector.broadcast %cst_45 : f32 to vector<8x128xf32>
    %133 = arith.addf %132, %131 : vector<8x128xf32>
    %134 = arith.divf %132, %133 : vector<8x128xf32>
    %135 = vector.extract_strided_slice %126 {offsets = [0, 128], sizes = [8, 128], strides = [1, 1]} : vector<8x384xf32> to vector<8x128xf32>
    %136 = vector.extract_strided_slice %122 {offsets = [0, 128], sizes = [8, 128], strides = [1, 1]} : vector<8x384xf32> to vector<8x128xf32>
    %137 = arith.addf %135, %136 : vector<8x128xf32>
    %138 = arith.negf %137 : vector<8x128xf32>
    %139 = math.exp %138 : vector<8x128xf32>
    %cst_46 = arith.constant 1.000000e+00 : f32
    %140 = vector.broadcast %cst_46 : f32 to vector<8x128xf32>
    %141 = arith.addf %140, %139 : vector<8x128xf32>
    %142 = arith.divf %140, %141 : vector<8x128xf32>
    %143 = vector.extract_strided_slice %126 {offsets = [0, 256], sizes = [8, 128], strides = [1, 1]} : vector<8x384xf32> to vector<8x128xf32>
    %144 = vector.extract_strided_slice %122 {offsets = [0, 256], sizes = [8, 128], strides = [1, 1]} : vector<8x384xf32> to vector<8x128xf32>
    %145 = arith.mulf %134, %144 : vector<8x128xf32>
    %146 = arith.addf %143, %145 : vector<8x128xf32>
    %147 = math.tanh %146 : vector<8x128xf32>
    %cst_47 = arith.constant 1.000000e+00 : f32
    %148 = vector.broadcast %cst_47 : f32 to vector<8x128xf32>
    %149 = arith.subf %148, %142 : vector<8x128xf32>
    %150 = arith.mulf %149, %147 : vector<8x128xf32>
    %151 = arith.mulf %142, %118 : vector<8x128xf32>
    %152 = arith.addf %150, %151 : vector<8x128xf32>
    %c4_i32 = arith.constant 4 : i32
    %153 = arith.truncf %152 : vector<8x128xf32> to vector<8x128xbf16>
    %c0_48 = arith.constant 0 : index
    %c0_49 = arith.constant 0 : index
    %154 = vector.load %arg4[%c0_48, %c0_49] : memref<128x384xbf16, #tpu.memory_space<vmem>>, vector<128x384xbf16>
    %cst_50 = arith.constant dense<0.000000e+00> : vector<8x384xf32>
    %155 = tpu.matmul %153, %154, %cst_50 {dimension_numbers = #tpu.dot_dimension_numbers<[1], [0], [0], [1], [0, 0, 1, 1], [], []>} : vector<8x128xbf16>, vector<128x384xbf16>, vector<8x384xf32> -> vector<8x384xf32>
    %156 = arith.addf %155, %15 : vector<8x384xf32>
    %c8_i32_51 = arith.constant 8 : i32
    %157 = arith.muli %c4_i32, %c8_i32_51 : i32
    %158 = tpu.assume_multiple %157, 8 : i32
    %159 = arith.index_cast %158 : i32 to index
    %c0_52 = arith.constant 0 : index
    %160 = vector.load %arg9[%159, %c0_52] : memref<64x384xf32, #tpu.memory_space<vmem>>, vector<8x384xf32>
    %161 = vector.extract_strided_slice %160 {offsets = [0, 0], sizes = [8, 128], strides = [1, 1]} : vector<8x384xf32> to vector<8x128xf32>
    %162 = vector.extract_strided_slice %156 {offsets = [0, 0], sizes = [8, 128], strides = [1, 1]} : vector<8x384xf32> to vector<8x128xf32>
    %163 = arith.addf %161, %162 : vector<8x128xf32>
    %164 = arith.negf %163 : vector<8x128xf32>
    %165 = math.exp %164 : vector<8x128xf32>
    %cst_53 = arith.constant 1.000000e+00 : f32
    %166 = vector.broadcast %cst_53 : f32 to vector<8x128xf32>
    %167 = arith.addf %166, %165 : vector<8x128xf32>
    %168 = arith.divf %166, %167 : vector<8x128xf32>
    %169 = vector.extract_strided_slice %160 {offsets = [0, 128], sizes = [8, 128], strides = [1, 1]} : vector<8x384xf32> to vector<8x128xf32>
    %170 = vector.extract_strided_slice %156 {offsets = [0, 128], sizes = [8, 128], strides = [1, 1]} : vector<8x384xf32> to vector<8x128xf32>
    %171 = arith.addf %169, %170 : vector<8x128xf32>
    %172 = arith.negf %171 : vector<8x128xf32>
    %173 = math.exp %172 : vector<8x128xf32>
    %cst_54 = arith.constant 1.000000e+00 : f32
    %174 = vector.broadcast %cst_54 : f32 to vector<8x128xf32>
    %175 = arith.addf %174, %173 : vector<8x128xf32>
    %176 = arith.divf %174, %175 : vector<8x128xf32>
    %177 = vector.extract_strided_slice %160 {offsets = [0, 256], sizes = [8, 128], strides = [1, 1]} : vector<8x384xf32> to vector<8x128xf32>
    %178 = vector.extract_strided_slice %156 {offsets = [0, 256], sizes = [8, 128], strides = [1, 1]} : vector<8x384xf32> to vector<8x128xf32>
    %179 = arith.mulf %168, %178 : vector<8x128xf32>
    %180 = arith.addf %177, %179 : vector<8x128xf32>
    %181 = math.tanh %180 : vector<8x128xf32>
    %cst_55 = arith.constant 1.000000e+00 : f32
    %182 = vector.broadcast %cst_55 : f32 to vector<8x128xf32>
    %183 = arith.subf %182, %176 : vector<8x128xf32>
    %184 = arith.mulf %183, %181 : vector<8x128xf32>
    %185 = arith.mulf %176, %152 : vector<8x128xf32>
    %186 = arith.addf %184, %185 : vector<8x128xf32>
    %c5_i32 = arith.constant 5 : i32
    %187 = arith.truncf %186 : vector<8x128xf32> to vector<8x128xbf16>
    %c0_56 = arith.constant 0 : index
    %c0_57 = arith.constant 0 : index
    %188 = vector.load %arg4[%c0_56, %c0_57] : memref<128x384xbf16, #tpu.memory_space<vmem>>, vector<128x384xbf16>
    %cst_58 = arith.constant dense<0.000000e+00> : vector<8x384xf32>
    %189 = tpu.matmul %187, %188, %cst_58 {dimension_numbers = #tpu.dot_dimension_numbers<[1], [0], [0], [1], [0, 0, 1, 1], [], []>} : vector<8x128xbf16>, vector<128x384xbf16>, vector<8x384xf32> -> vector<8x384xf32>
    %190 = arith.addf %189, %15 : vector<8x384xf32>
    %c8_i32_59 = arith.constant 8 : i32
    %191 = arith.muli %c5_i32, %c8_i32_59 : i32
    %192 = tpu.assume_multiple %191, 8 : i32
    %193 = arith.index_cast %192 : i32 to index
    %c0_60 = arith.constant 0 : index
    %194 = vector.load %arg9[%193, %c0_60] : memref<64x384xf32, #tpu.memory_space<vmem>>, vector<8x384xf32>
    %195 = vector.extract_strided_slice %194 {offsets = [0, 0], sizes = [8, 128], strides = [1, 1]} : vector<8x384xf32> to vector<8x128xf32>
    %196 = vector.extract_strided_slice %190 {offsets = [0, 0], sizes = [8, 128], strides = [1, 1]} : vector<8x384xf32> to vector<8x128xf32>
    %197 = arith.addf %195, %196 : vector<8x128xf32>
    %198 = arith.negf %197 : vector<8x128xf32>
    %199 = math.exp %198 : vector<8x128xf32>
    %cst_61 = arith.constant 1.000000e+00 : f32
    %200 = vector.broadcast %cst_61 : f32 to vector<8x128xf32>
    %201 = arith.addf %200, %199 : vector<8x128xf32>
    %202 = arith.divf %200, %201 : vector<8x128xf32>
    %203 = vector.extract_strided_slice %194 {offsets = [0, 128], sizes = [8, 128], strides = [1, 1]} : vector<8x384xf32> to vector<8x128xf32>
    %204 = vector.extract_strided_slice %190 {offsets = [0, 128], sizes = [8, 128], strides = [1, 1]} : vector<8x384xf32> to vector<8x128xf32>
    %205 = arith.addf %203, %204 : vector<8x128xf32>
    %206 = arith.negf %205 : vector<8x128xf32>
    %207 = math.exp %206 : vector<8x128xf32>
    %cst_62 = arith.constant 1.000000e+00 : f32
    %208 = vector.broadcast %cst_62 : f32 to vector<8x128xf32>
    %209 = arith.addf %208, %207 : vector<8x128xf32>
    %210 = arith.divf %208, %209 : vector<8x128xf32>
    %211 = vector.extract_strided_slice %194 {offsets = [0, 256], sizes = [8, 128], strides = [1, 1]} : vector<8x384xf32> to vector<8x128xf32>
    %212 = vector.extract_strided_slice %190 {offsets = [0, 256], sizes = [8, 128], strides = [1, 1]} : vector<8x384xf32> to vector<8x128xf32>
    %213 = arith.mulf %202, %212 : vector<8x128xf32>
    %214 = arith.addf %211, %213 : vector<8x128xf32>
    %215 = math.tanh %214 : vector<8x128xf32>
    %cst_63 = arith.constant 1.000000e+00 : f32
    %216 = vector.broadcast %cst_63 : f32 to vector<8x128xf32>
    %217 = arith.subf %216, %210 : vector<8x128xf32>
    %218 = arith.mulf %217, %215 : vector<8x128xf32>
    %219 = arith.mulf %210, %186 : vector<8x128xf32>
    %220 = arith.addf %218, %219 : vector<8x128xf32>
    %c6_i32 = arith.constant 6 : i32
    %221 = arith.truncf %220 : vector<8x128xf32> to vector<8x128xbf16>
    %c0_64 = arith.constant 0 : index
    %c0_65 = arith.constant 0 : index
    %222 = vector.load %arg4[%c0_64, %c0_65] : memref<128x384xbf16, #tpu.memory_space<vmem>>, vector<128x384xbf16>
    %cst_66 = arith.constant dense<0.000000e+00> : vector<8x384xf32>
    %223 = tpu.matmul %221, %222, %cst_66 {dimension_numbers = #tpu.dot_dimension_numbers<[1], [0], [0], [1], [0, 0, 1, 1], [], []>} : vector<8x128xbf16>, vector<128x384xbf16>, vector<8x384xf32> -> vector<8x384xf32>
    %224 = arith.addf %223, %15 : vector<8x384xf32>
    %c8_i32_67 = arith.constant 8 : i32
    %225 = arith.muli %c6_i32, %c8_i32_67 : i32
    %226 = tpu.assume_multiple %225, 8 : i32
    %227 = arith.index_cast %226 : i32 to index
    %c0_68 = arith.constant 0 : index
    %228 = vector.load %arg9[%227, %c0_68] : memref<64x384xf32, #tpu.memory_space<vmem>>, vector<8x384xf32>
    %229 = vector.extract_strided_slice %228 {offsets = [0, 0], sizes = [8, 128], strides = [1, 1]} : vector<8x384xf32> to vector<8x128xf32>
    %230 = vector.extract_strided_slice %224 {offsets = [0, 0], sizes = [8, 128], strides = [1, 1]} : vector<8x384xf32> to vector<8x128xf32>
    %231 = arith.addf %229, %230 : vector<8x128xf32>
    %232 = arith.negf %231 : vector<8x128xf32>
    %233 = math.exp %232 : vector<8x128xf32>
    %cst_69 = arith.constant 1.000000e+00 : f32
    %234 = vector.broadcast %cst_69 : f32 to vector<8x128xf32>
    %235 = arith.addf %234, %233 : vector<8x128xf32>
    %236 = arith.divf %234, %235 : vector<8x128xf32>
    %237 = vector.extract_strided_slice %228 {offsets = [0, 128], sizes = [8, 128], strides = [1, 1]} : vector<8x384xf32> to vector<8x128xf32>
    %238 = vector.extract_strided_slice %224 {offsets = [0, 128], sizes = [8, 128], strides = [1, 1]} : vector<8x384xf32> to vector<8x128xf32>
    %239 = arith.addf %237, %238 : vector<8x128xf32>
    %240 = arith.negf %239 : vector<8x128xf32>
    %241 = math.exp %240 : vector<8x128xf32>
    %cst_70 = arith.constant 1.000000e+00 : f32
    %242 = vector.broadcast %cst_70 : f32 to vector<8x128xf32>
    %243 = arith.addf %242, %241 : vector<8x128xf32>
    %244 = arith.divf %242, %243 : vector<8x128xf32>
    %245 = vector.extract_strided_slice %228 {offsets = [0, 256], sizes = [8, 128], strides = [1, 1]} : vector<8x384xf32> to vector<8x128xf32>
    %246 = vector.extract_strided_slice %224 {offsets = [0, 256], sizes = [8, 128], strides = [1, 1]} : vector<8x384xf32> to vector<8x128xf32>
    %247 = arith.mulf %236, %246 : vector<8x128xf32>
    %248 = arith.addf %245, %247 : vector<8x128xf32>
    %249 = math.tanh %248 : vector<8x128xf32>
    %cst_71 = arith.constant 1.000000e+00 : f32
    %250 = vector.broadcast %cst_71 : f32 to vector<8x128xf32>
    %251 = arith.subf %250, %244 : vector<8x128xf32>
    %252 = arith.mulf %251, %249 : vector<8x128xf32>
    %253 = arith.mulf %244, %220 : vector<8x128xf32>
    %254 = arith.addf %252, %253 : vector<8x128xf32>
    %c7_i32 = arith.constant 7 : i32
    %255 = arith.truncf %254 : vector<8x128xf32> to vector<8x128xbf16>
    %c0_72 = arith.constant 0 : index
    %c0_73 = arith.constant 0 : index
    %256 = vector.load %arg4[%c0_72, %c0_73] : memref<128x384xbf16, #tpu.memory_space<vmem>>, vector<128x384xbf16>
    %cst_74 = arith.constant dense<0.000000e+00> : vector<8x384xf32>
    %257 = tpu.matmul %255, %256, %cst_74 {dimension_numbers = #tpu.dot_dimension_numbers<[1], [0], [0], [1], [0, 0, 1, 1], [], []>} : vector<8x128xbf16>, vector<128x384xbf16>, vector<8x384xf32> -> vector<8x384xf32>
    %258 = arith.addf %257, %15 : vector<8x384xf32>
    %c8_i32_75 = arith.constant 8 : i32
    %259 = arith.muli %c7_i32, %c8_i32_75 : i32
    %260 = tpu.assume_multiple %259, 8 : i32
    %261 = arith.index_cast %260 : i32 to index
    %c0_76 = arith.constant 0 : index
    %262 = vector.load %arg9[%261, %c0_76] : memref<64x384xf32, #tpu.memory_space<vmem>>, vector<8x384xf32>
    %263 = vector.extract_strided_slice %262 {offsets = [0, 0], sizes = [8, 128], strides = [1, 1]} : vector<8x384xf32> to vector<8x128xf32>
    %264 = vector.extract_strided_slice %258 {offsets = [0, 0], sizes = [8, 128], strides = [1, 1]} : vector<8x384xf32> to vector<8x128xf32>
    %265 = arith.addf %263, %264 : vector<8x128xf32>
    %266 = arith.negf %265 : vector<8x128xf32>
    %267 = math.exp %266 : vector<8x128xf32>
    %cst_77 = arith.constant 1.000000e+00 : f32
    %268 = vector.broadcast %cst_77 : f32 to vector<8x128xf32>
    %269 = arith.addf %268, %267 : vector<8x128xf32>
    %270 = arith.divf %268, %269 : vector<8x128xf32>
    %271 = vector.extract_strided_slice %262 {offsets = [0, 128], sizes = [8, 128], strides = [1, 1]} : vector<8x384xf32> to vector<8x128xf32>
    %272 = vector.extract_strided_slice %258 {offsets = [0, 128], sizes = [8, 128], strides = [1, 1]} : vector<8x384xf32> to vector<8x128xf32>
    %273 = arith.addf %271, %272 : vector<8x128xf32>
    %274 = arith.negf %273 : vector<8x128xf32>
    %275 = math.exp %274 : vector<8x128xf32>
    %cst_78 = arith.constant 1.000000e+00 : f32
    %276 = vector.broadcast %cst_78 : f32 to vector<8x128xf32>
    %277 = arith.addf %276, %275 : vector<8x128xf32>
    %278 = arith.divf %276, %277 : vector<8x128xf32>
    %279 = vector.extract_strided_slice %262 {offsets = [0, 256], sizes = [8, 128], strides = [1, 1]} : vector<8x384xf32> to vector<8x128xf32>
    %280 = vector.extract_strided_slice %258 {offsets = [0, 256], sizes = [8, 128], strides = [1, 1]} : vector<8x384xf32> to vector<8x128xf32>
    %281 = arith.mulf %270, %280 : vector<8x128xf32>
    %282 = arith.addf %279, %281 : vector<8x128xf32>
    %283 = math.tanh %282 : vector<8x128xf32>
    %cst_79 = arith.constant 1.000000e+00 : f32
    %284 = vector.broadcast %cst_79 : f32 to vector<8x128xf32>
    %285 = arith.subf %284, %278 : vector<8x128xf32>
    %286 = arith.mulf %285, %283 : vector<8x128xf32>
    %287 = arith.mulf %278, %254 : vector<8x128xf32>
    %288 = arith.addf %286, %287 : vector<8x128xf32>
    %c8_i32_80 = arith.constant 8 : i32
    %c0_81 = arith.constant 0 : index
    %c0_82 = arith.constant 0 : index
    %289 = vector.load %arg7[%c0_81, %c0_82] : memref<8x128xf32, #tpu.memory_space<vmem>>, vector<8x128xf32>
    tpu.vector_store %arg7[%c0_81, %c0_82], %288 {strides = array<i32>} : memref<8x128xf32, #tpu.memory_space<vmem>>, vector<8x128xf32>,
    return
  }
  func.func @transform_0(%arg0: i32, %arg1: memref<64xi32, #tpu.memory_space<smem>>) -> (i32, i32) {
    %c0_i32 = arith.constant 0 : i32
    %c0_i32_0 = arith.constant 0 : i32
    %c0_i32_1 = arith.constant 0 : i32
    return %c0_i32, %c0_i32_0 : i32, i32
  }
  func.func @transform_1(%arg0: i32, %arg1: memref<64xi32, #tpu.memory_space<smem>>) -> (i32, i32) {
    %c0_i32 = arith.constant 0 : i32
    %c0_i32_0 = arith.constant 0 : i32
    %c0_i32_1 = arith.constant 0 : i32
    return %c0_i32, %c0_i32_0 : i32, i32
  }
  func.func @transform_2(%arg0: i32, %arg1: memref<64xi32, #tpu.memory_space<smem>>) -> (i32, i32) {
    %c0_i32 = arith.constant 0 : i32
    %c0_i32_0 = arith.constant 0 : i32
    %c0_i32_1 = arith.constant 0 : i32
    return %c0_i32, %c0_i32_0 : i32, i32
  }
  func.func @transform_3(%arg0: i32, %arg1: memref<64xi32, #tpu.memory_space<smem>>) -> (i32, i32) {
    %c0_i32 = arith.constant 0 : i32
    %c0_i32_0 = arith.constant 0 : i32
    %c0_i32_1 = arith.constant 0 : i32
    return %c0_i32, %c0_i32_0 : i32, i32
  }
  func.func @transform_4(%arg0: i32, %arg1: memref<64xi32, #tpu.memory_space<smem>>) -> (i32, i32) {
    %c0_i32 = arith.constant 0 : i32
    %c0_i32_0 = arith.constant 0 : i32
    %c0_i32_1 = arith.constant 0 : i32
    return %c0_i32, %c0_i32_0 : i32, i32
  }
  func.func @transform_5(%arg0: i32, %arg1: memref<64xi32, #tpu.memory_space<smem>>) -> (i32, i32) {
    %c0_i32 = arith.constant 0 : i32
    %c0_i32_0 = arith.constant 0 : i32
    %c0_i32_1 = arith.constant 0 : i32
    return %c0_i32, %c0_i32_0 : i32, i32
  }
}

</mosaic_0001>

<bundles_post_ra>
// kernel: encoder_forward.1
= control target key start
LH: loop header
LB: loop body
LE: loop exit
PB: predicated region body
PF: predicated region fallthrough
CT: control target
= control target key end

     0   :  { %s2448_s0 = inlined_call_operand.vmem [shape: s32[64], index: 0, kind: input, shape index: {}]   ;;  %s2449_s1 = inlined_call_operand.vmem [shape: f32[50,32], index: 1, kind: input, shape index: {}]   ;;  %s2450_s2 = inlined_call_operand.vmem [shape: bf16[32,384], index: 2, kind: input, shape index: {}]   ;;  %s2451_s3 = inlined_call_operand.hbm [shape: bf16[128,384], index: 3, kind: input, shape index: {}]   ;;  %s2452_s4 = inlined_call_operand.vmem [shape: f32[1,384], index: 4, kind: input, shape index: {}]   ;;  %s2453_s5 = inlined_call_operand.vmem [shape: f32[1,384], index: 5, kind: input, shape index: {}]   ;;  %s2454_s6 = inlined_call_operand.vmem [shape: f32[8,128], index: 6, kind: output, shape index: {}]  }
   0x1   :  { %s11_s23 = sshll.u32 %s2448_s0, 4  ;;  %s12_s23 = int_to_ptr.vmem [resolvable:$true] %s11_s23 }
   0x2   :  { %s1838_s24 = scalar_lea.vmem %s12_s23, 16  ;;  %p1843_p1 = scmp.lt.s32.totalorder %s12_s23, %s12_s23 }
   0x3   :  { %p1839_p0 = scmp.ne.s32.totalorder %s12_s23, %s1838_s24  ;;  %p1844_p2 = scmp.lt.s32.totalorder %s1838_s24, %s1838_s24 }
   0x5   :  { %p1845_p3 = por %p1844_p2, %p1843_p1 }
   0x7   :  { %p1846_p4 = pnand %p1845_p3, %p1839_p0 }
   0x9   :  { %1849 = shalt.err (!%p1846_p4)  }
   0xa   :  { %s1882_s25 = smov [#allocation5]  }
   0xb   :  { %14 = dma.vmem_to_smem %s12_s23, 16, %s1882_s25, [#allocation4] }
   0xc   :  { %1874 = dma.done.wait [#allocation4], 16 }
   0xd   :  { %1875 = vsyncadd [#allocation4], 4294967280 }
   0xe   :  { %16 = sfence }
   0xf   :  { %17 = vsyncpa [#allocation7], 0  ;;  %s1883_s26 = smov [#allocation6]  }
  0x10   :  { %s27_s27 = sshll.u32 %s1883_s26, 4  ;;  %s28_s27 = int_to_ptr.vmem [resolvable:$true] %s27_s27 }
  0x11   :  { %s1858_s28 = scalar_lea.vmem %s28_s27, 3072  ;;  %p1863_p6 = scmp.lt.s32.totalorder %s28_s27, %s28_s27 }
  0x12   :  { %p1859_p5 = scmp.ne.s32.totalorder %s28_s27, %s1858_s28  ;;  %p1864_p7 = scmp.lt.s32.totalorder %s1858_s28, %s1858_s28 }
  0x14   :  { %p1865_p8 = por %p1864_p7, %p1863_p6 }
  0x16   :  { %p1866_p9 = pnand %p1865_p8, %p1859_p5 }
  0x18   :  { %1869 = shalt.err (!%p1866_p9)
}
  0x19   :  { %s1884_s0 = smov 192   ;;  %s1885_s29 = smov 12  }
  0x1a   :  { %33 = dma.hbm_to_vmem [thread:$0]  %s2451_s3, 3072, %s28_s27, [#allocation7], %s1884_s0, %s1884_s0, %s1885_s29  }
  0x1b   :  { %1876 = dma.done.wait [#allocation7], 3072  }
  0x1c   :  { %1877 = vsyncadd [#allocation7], 4294964224  ;;  %v2457_v0 = vmov 0.0   ;;  %s1878_s10 = smov 0  }
  0x1d   :  { %46 = vst [vmem:[%s2454_s6] sm:$0xff] %v2457_v0 }
  0x1e LB: > { %s55_s11 = sld [smem:[#allocation5 + %s1880_s10]]  ;;  %vm59_vm0 = vcmask 253952   ;;  %s58_s3 = scalar_lea.vmem [#allocation2], %s1880_s10  ;;  %s1880_s10 = sphi %s1878_s10, %s53_s10  }
  0x1f   : > { %s53_s10 = sadd.s32 1, %s1880_s10  }
  0x20   : > { %p50_p10 = scmp.ge.s32.totalorder %s53_s10, 64  }
  0x21   :  { %v1694_v2 = vld [vmem:[%s2450_s2 + $0x1c] ss:$12 sps:$4 sm:$0xff] (%p50_p10)   ;;  %v1696_v3 = vld [vmem:[%s2450_s2 + $0x18] ss:$12 sps:$4 sm:$0xff] (%p50_p10)   ;;  %v2455_v4 = vmov (%p50_p10), 0   ;;  %vm130_vm1 = vcmask (%p50_p10), 261120   ;;  %v83_v47 = vlaneseq (%p50_p10) }
  0x22   :  { %52 = sbr.rel (!%p50_p10) target bundleno = 30 (0x1e), region = 65  ;;  %175 = vmatprep.mubr.bf16.mxu0 (%p50_p10), %v2455_v4  ;;  %155 = vmatprep.subr.bf16.mxu0 (%p50_p10), %v1694_v2  ;;  %v1697_v5 = vld [vmem:[%s2450_s2 + $0x4] ss:$12 sps:$4 sm:$0xff] (%p50_p10)   ;;  %v1699_v6 = vld [vmem:[%s2450_s2] ss:$12 sps:$4 sm:$0xff] (%p50_p10)   ;;  %vm1888_vm2 = vmmov (%p50_p10), 0  }
  0x23   :  { %156 = vmatpush1.bf16.msra.mxu0 (%p50_p10), %v1696_v3  ;;  %v1950_v10 = vld [vmem:[#allocation6 + $0xac] ss:$12 sps:$4 sm:$0xff] (%p50_p10)   ;;  %v1953_v11 = vld [vmem:[#allocation6 + $0xa8] ss:$12 sps:$4 sm:$0xff] (%p50_p10)   ;;  %v1958_v13 = vld [vmem:[#allocation6 + $0x90] ss:$12 sps:$4 sm:$0xff] (%p50_p10)  }
  0x24   : > { %s56_s14 = scalar_lea.vmem %s2449_s1, %s55_s11  ;;  %157 = vmatprep.subr.bf16.mxu0 (%p50_p10), %v1697_v5  ;;  %v1956_v12 = vld [vmem:[#allocation6 + $0x94] ss:$12 sps:$4 sm:$0xff] (%p50_p10)   ;;  %v1964_v16 = vld [vmem:[#allocation6 + $0x7c] ss:$12 sps:$4 sm:$0xff] (%p50_p10)   ;;  %v1970_v19 = vld [vmem:[#allocation6 + $0x78] ss:$12 sps:$4 sm:$0xff] (%p50_p10)  }
  0x25   : > { %v57_v1 = vld [vmem:[%s56_s14] sm:$0x1]  ;;  %v1973_v20 = vld [vmem:[#allocation6 + $0x64] ss:$12 sps:$4 sm:$0xff] (%p50_p10)   ;;  %v1721_v21 = vld [vmem:[%s2450_s2 + $0x8] ss:$12 sps:$4 sm:$0xff] (%p50_p10)  }
  0x26   : > { %60 = vst.msk [vmem:[%s58_s3] sm:$0x1] %vm59_vm0, %v57_v1  ;;  %v1717_v17 = vld [vmem:[%s2450_s2 + $0x20] ss:$12 sps:$4 sm:$0xff] (%p50_p10)   ;;  %v1986_v26 = vld [vmem:[#allocation6 + $0xb0] ss:$12 sps:$4 sm:$0xff] (%p50_p10)  }
  0x27   :  { %158 = vmatpush1.bf16.msra.mxu0 %v1699_v6  ;;  %1507 = vmatprep.subr.bf16.mxu1 %v1717_v17  ;;  %v1978_v22 = vld [vmem:[#allocation6 + $0x60] ss:$12 sps:$4 sm:$0xff]   ;;  %v1989_v28 = vld [vmem:[#allocation6 + $0x48] ss:$12 sps:$4 sm:$0xff]   ;;  %v1997_v30 = vld [vmem:[#allocation6 + $0x98] ss:$12 sps:$4 sm:$0xff]  }
  0x28   :  { %484 = vmatprep.subr.bf16.mxu0 %v1950_v10  ;;  %1508 = vmatpush3.bf16.msra.mxu1 %v1717_v17  ;;  %v1983_v25 = vld [vmem:[#allocation6 + $0x4c] ss:$12 sps:$4 sm:$0xff]   ;;  %v1992_v29 = vld [vmem:[#allocation6 + $0x34] ss:$12 sps:$4 sm:$0xff]   ;;  %v2003_v33 = vld [vmem:[#allocation6 + $0x30] ss:$12 sps:$4 sm:$0xff]  }
  0x29   :  { %1509 = vmatprep.subr.bf16.mxu1 %v1721_v21  ;;  %v2007_v34 = vld [vmem:[#allocation6 + $0x1c] ss:$12 sps:$4 sm:$0xff]   ;;  %v2010_v35 = vld [vmem:[#allocation6 + $0x80] ss:$12 sps:$4 sm:$0xff]   ;;  %v2014_v37 = vld [vmem:[#allocation6 + $0x18] ss:$12 sps:$4 sm:$0xff]  }
  0x2a   :  { %v2018_v38 = vld [vmem:[#allocation6 + $0x4] ss:$12 sps:$4 sm:$0xff]   ;;  %v2021_v39 = vld [vmem:[#allocation6 + $0x68] ss:$12 sps:$4 sm:$0xff]   ;;  %v2028_v40 = vld [vmem:[#allocation6] ss:$12 sps:$4 sm:$0xff]  }
  0x2b   :  { %v2034_v41 = vld [vmem:[%s2454_s6] sm:$0xff]  ;;  %v2038_v42 = vld [vmem:[#allocation6 + $0x50] ss:$12 sps:$4 sm:$0xff]   ;;  %v2058_v46 = vld [vmem:[#allocation6 + $0x8] ss:$12 sps:$4 sm:$0xff]   ;;  %v2094_v48 = vshrl.u32 %v83_v47, 7 }
  0x2c   :  { %1510 = vmatpush3.bf16.msra.mxu1 %v1721_v21  ;;  %v323_v43 = vpack.c.bf16 %v2034_v41, %v2034_v41  ;;  %v2045_v44 = vld [vmem:[#allocation6 + $0x38] ss:$12 sps:$4 sm:$0xff]   ;;  %v2052_v45 = vld [vmem:[#allocation6 + $0x20] ss:$12 sps:$4 sm:$0xff]  }
  0x2d   :  { %v61_v7 = vld [vmem:[#allocation2] sm:$0xff]  ;;  %v62_v8 = vld [vmem:[#allocation2 + $0x8] sm:$0xff]  ;;  %v63_v14 = vld [vmem:[#allocation2 + $0x10] sm:$0xff]  ;;  %1519 = vmatprep.subr.bf16.mxu1 %v2457_v0  ;;  %v85_v49 = vsub.s32 0, %v2094_v48  ;;  %v89_v52 = vsub.s32 1, %v2094_v48  ;;  %v2459_v59 = vsub.s32 2, %v2094_v48 }
  0x2e   :  { %v69_v9 = vpack.c.bf16 %v62_v8, %v61_v7  ;;  %v64_v15 = vld [vmem:[#allocation2 + $0x18] sm:$0xff]  ;;  %v65_v23 = vld [vmem:[#allocation2 + $0x20] sm:$0xff]  ;;  %v66_v24 = vld [vmem:[#allocation2 + $0x28] sm:$0xff] }
  0x2f   :  { %v70_v18 = vpack.c.bf16 %v64_v15, %v63_v14  ;;  %v71_v27 = vpack.c.bf16 %v66_v24, %v65_v23  ;;  %v67_v31 = vld [vmem:[#allocation2 + $0x30] sm:$0xff]  ;;  %v68_v32 = vld [vmem:[#allocation2 + $0x38] sm:$0xff]  ;;  %v81_v50 = vld [vmem:[%s2452_s4] sm:$0x7] }
  0x30   :  { %1511 = vmatprep.mubr.msk.bf16.mxu1 %vm130_vm1, %v69_v9  ;;  %1381 = vmatmul.mubr.msk.bf16.vlgmr.msra.gmra.mxu0 %vm130_vm1, %v69_v9  ;;  %v72_v36 = vpack.c.bf16 %v68_v32, %v67_v31  ;;  %v86_v54 = vrot.slane %v81_v50, %v85_v49  ;;  %v90_v56 = vrot.slane %v81_v50, %v89_v52 }
  0x31   :  { %485 = vmatpush1.bf16.msra.mxu0 %v1953_v11  ;;  %185 = vmatprep.mubr.bf16.mxu0 %v2455_v4  ;;  %v2110_v1 = vrot.slane %v81_v50, %v2459_v59 }
  0x32   :  { %486 = vmatprep.subr.bf16.mxu0 %v1956_v12  ;;  %1512 = vmatmul.mubr.msk.bf16.vlgmr.msra.gmra.mxu1 %vm130_vm1, %v70_v18 }
  0x33   :  { %1520 = vmatpush3.bf16.msra.mxu1 %v1986_v26  ;;  %1515 = vmatprep.mubr.msk.bf16.mxu1 %vm130_vm1, %v71_v27 }
  0x34   :  { %1521 = vmatprep.subr.bf16.mxu1 %v2457_v0 }
  0x35   :  { %487 = vmatpush1.bf16.msra.mxu0 %v1958_v13 }
  0x36   :  { %488 = vmatprep.subr.bf16.mxu0 %v1964_v16 }
  0x37   :  { %1522 = vmatpush3.bf16.msra.mxu1 %v1997_v30 }
  0x38   :  { %1382 = vmatmul.mubr.msk.bf16.gmra.mxu0 %vm130_vm1, %v70_v18  ;;  %1523 = vmatprep.subr.bf16.mxu1 %v2457_v0 }
  0x39   :  { %489 = vmatpush1.bf16.msra.mxu0 %v1970_v19  ;;  %195 = vmatprep.mubr.bf16.mxu0 %v2455_v4 }
  0x3a   :  { %490 = vmatprep.subr.bf16.mxu0 %v1973_v20  ;;  %1516 = vmatmul.mubr.msk.bf16.gmra.mxu1 %vm130_vm1, %v72_v36 }
  0x3b   :  { %1524 = vmatpush3.bf16.msra.mxu1 %v2010_v35  ;;  %1535 = vmatprep.mubr.msk.bf16.mxu1 %vm1888_vm2, %v2457_v0 }
  0x3c   :  { %1525 = vmatprep.subr.bf16.mxu1 %v2457_v0 }
  0x3d   :  { %491 = vmatpush1.bf16.msra.mxu0 %v1978_v22 }
  0x3e   :  { %492 = vmatprep.subr.bf16.mxu0 %v1983_v25 }
  0x3f   :  { %1526 = vmatpush3.bf16.msra.mxu1 %v2021_v39 }
  0x40   :  { %1383 = vmatmul.mubr.msk.bf16.gmra.mxu0 %vm130_vm1, %v71_v27  ;;  %1527 = vmatprep.subr.bf16.mxu1 %v2457_v0 }
  0x41   :  { %493 = vmatpush1.bf16.msra.mxu0 %v1989_v28  ;;  %205 = vmatprep.mubr.bf16.mxu0 %v2455_v4 }
  0x42   :  { %494 = vmatprep.subr.bf16.mxu0 %v1992_v29 }
  0x43   :  { %1528 = vmatpush3.bf16.msra.mxu1 %v2038_v42 }
  0x44   :  { %1529 = vmatprep.subr.bf16.mxu1 %v2457_v0 }
  0x45   :  { %495 = vmatpush1.bf16.msra.mxu0 %v2003_v33 }
  0x46   :  { %496 = vmatprep.subr.bf16.mxu0 %v2007_v34 }
  0x47   :  { %1530 = vmatpush3.bf16.msra.mxu1 %v2045_v44 }
  0x48   :  { %1384 = vmatmul.mubr.msk.bf16.gmra.mxu0 %vm130_vm1, %v72_v36  ;;  %1531 = vmatprep.subr.bf16.mxu1 %v2457_v0 }
  0x49   :  { %497 = vmatpush1.bf16.msra.mxu0 %v2014_v37  ;;  %516 = vmatprep.mubr.bf16.mxu0 %v2455_v4 }
  0x4a   :  { %498 = vmatprep.subr.bf16.mxu0 %v2018_v38 }
  0x4b   :  { %1532 = vmatpush3.bf16.msra.mxu1 %v2052_v45 }
  0x4c   :  { %1533 = vmatprep.subr.bf16.mxu1 %v2457_v0 }
  0x4d   :  { %499 = vmatpush1.bf16.msra.mxu0 %v2028_v40 }
  0x4e   :  { %593 = vmatprep.subr.bf16.mxu0 %v1950_v10 }
  0x4f   :  { %1534 = vmatpush3.bf16.msra.mxu1 %v2058_v46 }
  0x50   :  { %517 = vmatmul.mubr.bf16.vlgmr.msra.gmra.mxu0 %v323_v43  ;;  %1539 = vmatprep.subr.bf16.mxu1 %v2457_v0 }
  0x51   :  { %594 = vmatpush1.bf16.msra.mxu0 %v1953_v11  ;;  %625 = vmatprep.mubr.bf16.mxu0 %v2455_v4 }
  0x52   :  { %595 = vmatprep.subr.bf16.mxu0 %v1956_v12  ;;  %1536 = vmatmul.mubr.bf16.vlgmr.msra.gmra.mxu1 %v323_v43 }
  0x53   :  { %1540 = vmatpush3.bf16.msra.mxu1 %v1986_v26  ;;  %1555 = vmatprep.mubr.msk.bf16.mxu1 %vm1888_vm2, %v2457_v0 }
  0x54   :  { %1541 = vmatprep.subr.bf16.mxu1 %v2457_v0 }
  0x55   :  { %596 = vmatpush1.bf16.msra.mxu0 %v1958_v13 }
  0x56   :  { %597 = vmatprep.subr.bf16.mxu0 %v1964_v16 }
  0x57   :  { %1542 = vmatpush3.bf16.msra.mxu1 %v1997_v30 }
  0x58   :  { %1543 = vmatprep.subr.bf16.mxu1 %v2457_v0 }
  0x59   :  { %598 = vmatpush1.bf16.msra.mxu0 %v1970_v19 }
  0x5a   :  { %599 = vmatprep.subr.bf16.mxu0 %v1973_v20 }
  0x5b   :  { %1544 = vmatpush3.bf16.msra.mxu1 %v2010_v35 }
  0x5c   :  { %1545 = vmatprep.subr.bf16.mxu1 %v2457_v0 }
  0x5d   :  { %600 = vmatpush1.bf16.msra.mxu0 %v1978_v22 }
  0x5e   :  { %601 = vmatprep.subr.bf16.mxu0 %v1983_v25 }
  0x5f   :  { %1546 = vmatpush3.bf16.msra.mxu1 %v2021_v39 }
  0x60   :  { %1547 = vmatprep.subr.bf16.mxu1 %v2457_v0 }
  0x61   :  { %602 = vmatpush1.bf16.msra.mxu0 %v1989_v28 }
  0x62   :  { %603 = vmatprep.subr.bf16.mxu0 %v1992_v29 }
  0x63   :  { %1548 = vmatpush3.bf16.msra.mxu1 %v2038_v42 }
  0x64   :  { %1549 = vmatprep.subr.bf16.mxu1 %v2457_v0 }
  0x65   :  { %604 = vmatpush1.bf16.msra.mxu0 %v2003_v33 }
  0x66   :  { %605 = vmatprep.subr.bf16.mxu0 %v2007_v34 }
  0x67   :  { %1550 = vmatpush3.bf16.msra.mxu1 %v2045_v44 }
  0x68   :  { %1551 = vmatprep.subr.bf16.mxu1 %v2457_v0 }
  0x69   :  { %606 = vmatpush1.bf16.msra.mxu0 %v2014_v37 }
  0x6a   :  { %607 = vmatprep.subr.bf16.mxu0 %v2018_v38 }
  0x6b   :  { %1552 = vmatpush3.bf16.msra.mxu1 %v2052_v45 }
  0x6c   :  { %1553 = vmatprep.subr.bf16.mxu1 %v2457_v0 }
  0x6d   :  { %608 = vmatpush1.bf16.msra.mxu0 %v2028_v40 }
  0x6e   :  { %702 = vmatprep.subr.bf16.mxu0 %v1950_v10 }
  0x6f   :  { %1554 = vmatpush3.bf16.msra.mxu1 %v2058_v46 }
  0x70   :  { %1559 = vmatprep.subr.bf16.mxu1 %v2457_v0 }
  0xf0   :  { %v177_v51 = vpop.f32.mrf.mxu0 }
  0xf1   :  { %v178_v59 = vadd.f32 %v177_v51, %v86_v54 }
  0xf2   :  { %v179_v53 = vpop.f32.mrf.mxu0  ;;  %v1513_v6 = vpop.f32.mrf.mxu1 }
  0xf3   :  { %v2117_v8 = vadd.f32 %v1513_v6, %v2110_v1 }
  0xf4   :  { %v181_v55 = vpop.f32.mrf.mxu0  ;;  %v250_v14 = vpop.f32.mrf.mxu1 }
  0xf5   :  { %v2101_v57 = vadd.f32 %v181_v55, %v86_v54 }
  0xf6   :  { %v183_v58 = vpop.f32.mrf.mxu0  ;;  %v1514_v18 = vpop.f32.mrf.mxu1 }
  0xf7   :  { %v2104_v60 = vadd.f32 %v183_v58, %v90_v56  ;;  %v2124_v23 = vadd.f32 %v1514_v18, %v2110_v1 }
  0xf8   :  { %v187_v61 = vpop.f32.mrf.mxu0  ;;  %v253_v27 = vpop.f32.mrf.mxu1 }
  0xf9   :  { %v2106_v62 = vadd.f32 %v187_v61, %v86_v54  ;;  %v2129_v32 = vadd.f32 %v253_v27, %v2110_v1 }
  0xfa   :  { %v189_v63 = vpop.f32.mrf.mxu0  ;;  %v1517_v43 = vpop.f32.mrf.mxu1 }
  0xfb   :  { %v2112_v2 = vadd.f32 %v189_v63, %v90_v56  ;;  %v2134_v50 = vadd.f32 %v1517_v43, %v2110_v1 }
  0xfc   :  { %v191_v3 = vpop.f32.mrf.mxu0  ;;  %v266_v58 = vpop.f32.mrf.mxu1 }
  0xfd   :  { %v2114_v5 = vadd.f32 %v191_v3, %v86_v54  ;;  %2460 = vst [vmem:[#allocation10_spill] sm:$0xff] %v2134_v50  ;;  %v2139_v63 = vadd.f32 %v266_v58, %v2110_v1 }
  0xfe   :  { %v193_v7 = vpop.f32.mrf.mxu0  ;;  %v1518_v6 = vpop.f32.mrf.mxu1 }
  0xff   :  { %v2119_v9 = vadd.f32 %v193_v7, %v90_v56  ;;  %v2147_v18 = vadd.f32 %v1518_v6, %v2110_v1 }
 0x100   :  { %v197_v15 = vpop.f32.mrf.mxu0  ;;  %v269_v27 = vpop.f32.mrf.mxu1 }
 0x101   :  { %v2121_v17 = vadd.f32 %v197_v15, %v86_v54  ;;  %v305_v15 = vld [vmem:[%s2453_s5] sm:$0x7]  ;;  %2463 = vst [vmem:[#allocation13_spill] sm:$0xff] %v2147_v18  ;;  %v2152_v43 = vadd.f32 %v269_v27, %v2110_v1 }
 0x102   :  { %v199_v21 = vpop.f32.mrf.mxu0  ;;  %v2156_v58 = vrot.slane %v305_v15, %v85_v49  ;;  %v2161_v6 = vrot.slane %v305_v15, %v89_v52  ;;  %v2468_v52 = vsub.s32 2, %v2094_v48 }
 0x103   :  { %v2126_v24 = vadd.f32 %v199_v21, %v90_v56  ;;  %2465 = vst [vmem:[#allocation15_spill] sm:$0xff] %v2152_v43 }
 0x104   :  { %v201_v31 = vpop.f32.mrf.mxu0 }
 0x105   :  { %v2131_v36 = vadd.f32 %v201_v31, %v86_v54 }
 0x106   :  { %v203_v47 = vpop.f32.mrf.mxu0 }
 0x107   :  { %v2136_v55 = vadd.f32 %v203_v47, %v90_v56 }
 0x108   :  { %v207_v61 = vpop.f32.mrf.mxu0 }
 0x109   :  { %2461 = vst [vmem:[#allocation11_spill] sm:$0xff] %v2136_v55  ;;  %v2141_v3 = vadd.f32 %v207_v61, %v86_v54 }
 0x10a   :  { %v209_v7 = vpop.f32.mrf.mxu0 }
 0x10b   :  { %2462 = vst [vmem:[#allocation12_spill] sm:$0xff] %v2141_v3  ;;  %v2149_v21 = vadd.f32 %v209_v7, %v90_v56 }
 0x10c   :  { %v211_v31 = vpop.f32.mrf.mxu0 }
 0x10d   :  { %2464 = vst [vmem:[#allocation14_spill] sm:$0xff] %v2149_v21  ;;  %v2154_v47 = vadd.f32 %v211_v31, %v86_v54  ;;  %v180_v31 = vadd.f32 %v179_v53, %v90_v56 }
 0x10e   :  { %v213_v61 = vpop.f32.mrf.mxu0 }
 0x10f   :  { %2466 = vst [vmem:[#allocation16_spill] sm:$0xff] %v2154_v47  ;;  %v2158_v4 = vadd.f32 %v213_v61, %v90_v56  ;;  %v251_v56 = vadd.f32 %v250_v14, %v2110_v1  ;;  %v2469_v1 = vmov 0.0   ;;  %v2470_v14 = vmov 0  }
 0x110   :  { %v518_v0 = vpop.f32.mrf.mxu0 }
 0x111   :  { %2467 = vst [vmem:[#allocation17_spill] sm:$0xff] %v2158_v4  ;;  %v519_v50 = vadd.f32 %v518_v0, %v2156_v58 }
 0x112   :  { %v520_v7 = vpop.f32.mrf.mxu0  ;;  %v559_v55 = vpop.f32.mrf.mxu1 }
 0x113   :  { %v571_v18 = vadd.f32 %v519_v50, %v178_v59  ;;  %v521_v27 = vadd.f32 %v520_v7, %v2161_v6  ;;  %v2166_v59 = vrot.slane %v305_v15, %v2468_v52 }
 0x114   :  { %v522_v21 = vpop.f32.mrf.mxu0  ;;  %v1537_v61 = vpop.f32.mrf.mxu1 }
 0x115   :  { %v1413_v3 = vmul.f32 -1.442695, %v571_v18  ;;  %v578_v49 = vadd.f32 %v521_v27, %v180_v31  ;;  %v560_v21 = vadd.f32 %v559_v55, %v2166_v59 }
 0x116   :  { %v523_v43 = vpop.f32.mrf.mxu0  ;;  %v562_v4 = vpop.f32.mrf.mxu1 }
 0x117   :  { %1734 = vpow2.f32 %v1413_v3  ;;  %v1414_v47 = vmul.f32 -1.442695, %v578_v49 }
 0x118   :  { %v1538_v51 = vpop.f32.mrf.mxu1 }
 0x119   :  { %1736 = vpow2.f32 %v1414_v47 }
 0x124   :  { %v1735_v54 = vpop.eup %1734 }
 0x125   :  { %v575_v0 = vadd.f32 1.0, %v1735_v54 }
 0x126   :  { %v1737_v50 = vpop.eup %1736 }
 0x127   :  { %1738 = vrcp.f32 %v575_v0  ;;  %v582_v18 = vadd.f32 1.0, %v1737_v50 }
 0x129   :  { %1740 = vrcp.f32 %v582_v18 }
 0x134   :  { %v1739_v53 = vpop.eup %1738 }
 0x135   :  { %v585_v3 = vmul.f32 %v1739_v53, %v560_v21 }
 0x136   :  { %v1741_v4 = vpop.eup %1740 }
 0x137   :  { %v586_v43 = vadd.f32 %v585_v3, %v251_v56  ;;  %v588_v47 = vsub.f32 1.0, %v1741_v4  ;;  %v590_v31 = vmul.f32 %v1741_v4, %v2034_v41 }
 0x139   :  { %1742 = vtanh.f32 %v586_v43 }
 0x146   :  { %v1743_v7 = vpop.eup %1742 }
 0x147   :  { %v589_v27 = vmul.f32 %v1743_v7, %v588_v47 }
 0x149   :  { %v2171_v48 = vadd.f32 %v590_v31, %v589_v27 }
 0x14b   :  { %v592_v15 = vpack.c.bf16 %v2171_v48, %v2171_v48 }
 0x14d   :  { %626 = vmatmul.mubr.bf16.vlgmr.msra.gmra.mxu0 %v592_v15  ;;  %1556 = vmatmul.mubr.bf16.vlgmr.msra.gmra.mxu1 %v592_v15 }
 0x14e   :  { %703 = vmatpush1.bf16.msra.mxu0 %v1953_v11  ;;  %1560 = vmatpush3.bf16.msra.mxu1 %v1986_v26 }
 0x14f   :  { %704 = vmatprep.subr.bf16.mxu0 %v1956_v12  ;;  %1561 = vmatprep.subr.bf16.mxu1 %v2469_v1 }
 0x150   :  { %734 = vmatprep.mubr.bf16.mxu0 %v2470_v14  ;;  %1575 = vmatprep.mubr.msk.bf16.mxu1 %vm1888_vm2, %v2469_v1 }
 0x152   :  { %705 = vmatpush1.bf16.msra.mxu0 %v1958_v13  ;;  %1562 = vmatpush3.bf16.msra.mxu1 %v1997_v30 }
 0x153   :  { %706 = vmatprep.subr.bf16.mxu0 %v1964_v16  ;;  %1563 = vmatprep.subr.bf16.mxu1 %v2469_v1 }
 0x156   :  { %707 = vmatpush1.bf16.msra.mxu0 %v1970_v19  ;;  %1564 = vmatpush3.bf16.msra.mxu1 %v2010_v35 }
 0x157   :  { %708 = vmatprep.subr.bf16.mxu0 %v1973_v20  ;;  %1565 = vmatprep.subr.bf16.mxu1 %v2469_v1 }
 0x15a   :  { %709 = vmatpush1.bf16.msra.mxu0 %v1978_v22  ;;  %1566 = vmatpush3.bf16.msra.mxu1 %v2021_v39 }
 0x15b   :  { %710 = vmatprep.subr.bf16.mxu0 %v1983_v25  ;;  %1567 = vmatprep.subr.bf16.mxu1 %v2469_v1 }
 0x15e   :  { %711 = vmatpush1.bf16.msra.mxu0 %v1989_v28  ;;  %1568 = vmatpush3.bf16.msra.mxu1 %v2038_v42 }
 0x15f   :  { %712 = vmatprep.subr.bf16.mxu0 %v1992_v29  ;;  %1569 = vmatprep.subr.bf16.mxu1 %v2469_v1 }
 0x162   :  { %713 = vmatpush1.bf16.msra.mxu0 %v2003_v33  ;;  %1570 = vmatpush3.bf16.msra.mxu1 %v2045_v44 }
 0x163   :  { %714 = vmatprep.subr.bf16.mxu0 %v2007_v34  ;;  %1571 = vmatprep.subr.bf16.mxu1 %v2469_v1 }
 0x166   :  { %715 = vmatpush1.bf16.msra.mxu0 %v2014_v37  ;;  %1572 = vmatpush3.bf16.msra.mxu1 %v2052_v45 }
 0x167   :  { %716 = vmatprep.subr.bf16.mxu0 %v2018_v38  ;;  %1573 = vmatprep.subr.bf16.mxu1 %v2469_v1 }
 0x16a   :  { %717 = vmatpush1.bf16.msra.mxu0 %v2028_v40  ;;  %1574 = vmatpush3.bf16.msra.mxu1 %v2058_v46 }
 0x16b   :  { %811 = vmatprep.subr.bf16.mxu0 %v1950_v10  ;;  %1579 = vmatprep.subr.bf16.mxu1 %v2469_v1 }
 0x20d   :  { %v627_v41 = vpop.f32.mrf.mxu0  ;;  %v668_v55 = vpop.f32.mrf.mxu1 }
 0x20e   :  { %v628_v49 = vadd.f32 %v627_v41, %v2156_v58  ;;  %v669_v27 = vadd.f32 %v668_v55, %v2166_v59 }
 0x20f   :  { %v629_v61 = vpop.f32.mrf.mxu0  ;;  %v1557_v51 = vpop.f32.mrf.mxu1 }
 0x210   :  { %v680_v54 = vadd.f32 %v628_v49, %v2101_v57  ;;  %v630_v18 = vadd.f32 %v629_v61, %v2161_v6 }
 0x211   :  { %v631_v0 = vpop.f32.mrf.mxu0  ;;  %v671_v52 = vpop.f32.mrf.mxu1 }
 0x212   :  { %v1415_v50 = vmul.f32 -1.442695, %v680_v54  ;;  %v687_v56 = vadd.f32 %v630_v18, %v2104_v60 }
 0x213   :  { %v632_v21 = vpop.f32.mrf.mxu0  ;;  %v1558_v53 = vpop.f32.mrf.mxu1 }
 0x214   :  { %1744 = vpow2.f32 %v1415_v50  ;;  %v1416_v3 = vmul.f32 -1.442695, %v687_v56 }
 0x216   :  { %1746 = vpow2.f32 %v1416_v3 }
 0x221   :  { %v1745_v43 = vpop.eup %1744 }
 0x222   :  { %v684_v4 = vadd.f32 1.0, %v1745_v43 }
 0x223   :  { %v1747_v47 = vpop.eup %1746 }
 0x224   :  { %1748 = vrcp.f32 %v684_v4  ;;  %v691_v7 = vadd.f32 1.0, %v1747_v47 }
 0x226   :  { %1750 = vrcp.f32 %v691_v7 }
 0x231   :  { %v1749_v57 = vpop.eup %1748 }
 0x232   :  { %v694_v31 = vmul.f32 %v1749_v57, %v669_v27 }
 0x233   :  { %v1751_v41 = vpop.eup %1750 }
 0x234   :  { %v695_v15 = vadd.f32 %v694_v31, %v2129_v32  ;;  %v697_v49 = vsub.f32 1.0, %v1751_v41  ;;  %v699_v60 = vmul.f32 %v1751_v41, %v2171_v48 }
 0x236   :  { %1752 = vtanh.f32 %v695_v15 }
 0x243   :  { %v1753_v61 = vpop.eup %1752 }
 0x244   :  { %v698_v51 = vmul.f32 %v1753_v61, %v697_v49 }
 0x246   :  { %v2217_v54 = vadd.f32 %v699_v60, %v698_v51 }
 0x248   :  { %v701_v0 = vpack.c.bf16 %v2217_v54, %v2217_v54 }
 0x24a   :  { %735 = vmatmul.mubr.bf16.vlgmr.msra.gmra.mxu0 %v701_v0  ;;  %1576 = vmatmul.mubr.bf16.vlgmr.msra.gmra.mxu1 %v701_v0 }
 0x24b   :  { %812 = vmatpush1.bf16.msra.mxu0 %v1953_v11  ;;  %1580 = vmatpush3.bf16.msra.mxu1 %v1986_v26 }
 0x24c   :  { %813 = vmatprep.subr.bf16.mxu0 %v1956_v12  ;;  %1581 = vmatprep.subr.bf16.mxu1 %v2469_v1 }
 0x24d   :  { %843 = vmatprep.mubr.bf16.mxu0 %v2470_v14  ;;  %1595 = vmatprep.mubr.msk.bf16.mxu1 %vm1888_vm2, %v2469_v1 }
 0x24f   :  { %814 = vmatpush1.bf16.msra.mxu0 %v1958_v13  ;;  %1582 = vmatpush3.bf16.msra.mxu1 %v1997_v30 }
 0x250   :  { %815 = vmatprep.subr.bf16.mxu0 %v1964_v16  ;;  %1583 = vmatprep.subr.bf16.mxu1 %v2469_v1 }
 0x253   :  { %816 = vmatpush1.bf16.msra.mxu0 %v1970_v19  ;;  %1584 = vmatpush3.bf16.msra.mxu1 %v2010_v35 }
 0x254   :  { %817 = vmatprep.subr.bf16.mxu0 %v1973_v20  ;;  %1585 = vmatprep.subr.bf16.mxu1 %v2469_v1 }
 0x257   :  { %818 = vmatpush1.bf16.msra.mxu0 %v1978_v22  ;;  %1586 = vmatpush3.bf16.msra.mxu1 %v2021_v39 }
 0x258   :  { %819 = vmatprep.subr.bf16.mxu0 %v1983_v25  ;;  %1587 = vmatprep.subr.bf16.mxu1 %v2469_v1 }
 0x25b   :  { %820 = vmatpush1.bf16.msra.mxu0 %v1989_v28  ;;  %1588 = vmatpush3.bf16.msra.mxu1 %v2038_v42 }
 0x25c   :  { %821 = vmatprep.subr.bf16.mxu0 %v1992_v29  ;;  %1589 = vmatprep.subr.bf16.mxu1 %v2469_v1 }
 0x25f   :  { %822 = vmatpush1.bf16.msra.mxu0 %v2003_v33  ;;  %1590 = vmatpush3.bf16.msra.mxu1 %v2045_v44 }
 0x260   :  { %823 = vmatprep.subr.bf16.mxu0 %v2007_v34  ;;  %1591 = vmatprep.subr.bf16.mxu1 %v2469_v1 }
 0x263   :  { %824 = vmatpush1.bf16.msra.mxu0 %v2014_v37  ;;  %1592 = vmatpush3.bf16.msra.mxu1 %v2052_v45 }
 0x264   :  { %825 = vmatprep.subr.bf16.mxu0 %v2018_v38  ;;  %1593 = vmatprep.subr.bf16.mxu1 %v2469_v1 }
 0x267   :  { %826 = vmatpush1.bf16.msra.mxu0 %v2028_v40  ;;  %1594 = vmatpush3.bf16.msra.mxu1 %v2058_v46 }
 0x268   :  { %920 = vmatprep.subr.bf16.mxu0 %v1950_v10  ;;  %1599 = vmatprep.subr.bf16.mxu1 %v2469_v1 }
 0x30a   :  { %v736_v32 = vpop.f32.mrf.mxu0  ;;  %v777_v48 = vpop.f32.mrf.mxu1 }
 0x30b   :  { %v737_v55 = vadd.f32 %v736_v32, %v2156_v58  ;;  %v778_v41 = vadd.f32 %v777_v48, %v2166_v59 }
 0x30c   :  { %v738_v52 = vpop.f32.mrf.mxu0  ;;  %v1577_v50 = vpop.f32.mrf.mxu1 }
 0x30d   :  { %v789_v18 = vadd.f32 %v737_v55, %v2106_v62  ;;  %v739_v3 = vadd.f32 %v738_v52, %v2161_v6 }
 0x30e   :  { %v740_v21 = vpop.f32.mrf.mxu0  ;;  %v780_v53 = vpop.f32.mrf.mxu1 }
 0x30f   :  { %v1417_v56 = vmul.f32 -1.442695, %v789_v18  ;;  %v796_v47 = vadd.f32 %v739_v3, %v2112_v2 }
 0x310   :  { %v741_v43 = vpop.f32.mrf.mxu0  ;;  %v1578_v4 = vpop.f32.mrf.mxu1 }
 0x311   :  { %1754 = vpow2.f32 %v1417_v56  ;;  %v1418_v7 = vmul.f32 -1.442695, %v796_v47 }
 0x313   :  { %1756 = vpow2.f32 %v1418_v7 }
 0x31e   :  { %v1755_v27 = vpop.eup %1754 }
 0x31f   :  { %v793_v57 = vadd.f32 1.0, %v1755_v27 }
 0x320   :  { %v1757_v31 = vpop.eup %1756 }
 0x321   :  { %1758 = vrcp.f32 %v793_v57  ;;  %v800_v15 = vadd.f32 1.0, %v1757_v31 }
 0x323   :  { %1760 = vrcp.f32 %v800_v15 }
 0x32e   :  { %v1759_v62 = vpop.eup %1758 }
 0x32f   :  { %v803_v49 = vmul.f32 %v1759_v62, %v778_v41 }
 0x330   :  { %v1761_v51 = vpop.eup %1760 }
 0x331   :  { %v804_v61 = vadd.f32 %v803_v49, %v2117_v8  ;;  %v806_v60 = vsub.f32 1.0, %v1761_v51  ;;  %v808_v2 = vmul.f32 %v1761_v51, %v2217_v54 }
 0x333   :  { %1762 = vtanh.f32 %v804_v61 }
 0x340   :  { %v1763_v0 = vpop.eup %1762 }
 0x341   :  { %v807_v32 = vmul.f32 %v1763_v0, %v806_v60 }
 0x343   :  { %v2263_v55 = vadd.f32 %v808_v2, %v807_v32 }
 0x345   :  { %v810_v52 = vpack.c.bf16 %v2263_v55, %v2263_v55 }
 0x347   :  { %844 = vmatmul.mubr.bf16.vlgmr.msra.gmra.mxu0 %v810_v52  ;;  %1596 = vmatmul.mubr.bf16.vlgmr.msra.gmra.mxu1 %v810_v52 }
 0x348   :  { %921 = vmatpush1.bf16.msra.mxu0 %v1953_v11  ;;  %1600 = vmatpush3.bf16.msra.mxu1 %v1986_v26 }
 0x349   :  { %922 = vmatprep.subr.bf16.mxu0 %v1956_v12  ;;  %1601 = vmatprep.subr.bf16.mxu1 %v2469_v1 }
 0x34a   :  { %952 = vmatprep.mubr.bf16.mxu0 %v2470_v14  ;;  %1615 = vmatprep.mubr.msk.bf16.mxu1 %vm1888_vm2, %v2469_v1 }
 0x34c   :  { %923 = vmatpush1.bf16.msra.mxu0 %v1958_v13  ;;  %1602 = vmatpush3.bf16.msra.mxu1 %v1997_v30 }
 0x34d   :  { %924 = vmatprep.subr.bf16.mxu0 %v1964_v16  ;;  %1603 = vmatprep.subr.bf16.mxu1 %v2469_v1 }
 0x350   :  { %925 = vmatpush1.bf16.msra.mxu0 %v1970_v19  ;;  %1604 = vmatpush3.bf16.msra.mxu1 %v2010_v35 }
 0x351   :  { %926 = vmatprep.subr.bf16.mxu0 %v1973_v20  ;;  %1605 = vmatprep.subr.bf16.mxu1 %v2469_v1 }
 0x354   :  { %927 = vmatpush1.bf16.msra.mxu0 %v1978_v22  ;;  %1606 = vmatpush3.bf16.msra.mxu1 %v2021_v39 }
 0x355   :  { %928 = vmatprep.subr.bf16.mxu0 %v1983_v25  ;;  %1607 = vmatprep.subr.bf16.mxu1 %v2469_v1 }
 0x358   :  { %929 = vmatpush1.bf16.msra.mxu0 %v1989_v28  ;;  %1608 = vmatpush3.bf16.msra.mxu1 %v2038_v42 }
 0x359   :  { %930 = vmatprep.subr.bf16.mxu0 %v1992_v29  ;;  %1609 = vmatprep.subr.bf16.mxu1 %v2469_v1 }
 0x35c   :  { %931 = vmatpush1.bf16.msra.mxu0 %v2003_v33  ;;  %1610 = vmatpush3.bf16.msra.mxu1 %v2045_v44 }
 0x35d   :  { %932 = vmatprep.subr.bf16.mxu0 %v2007_v34  ;;  %1611 = vmatprep.subr.bf16.mxu1 %v2469_v1 }
 0x360   :  { %933 = vmatpush1.bf16.msra.mxu0 %v2014_v37  ;;  %1612 = vmatpush3.bf16.msra.mxu1 %v2052_v45 }
 0x361   :  { %934 = vmatprep.subr.bf16.mxu0 %v2018_v38  ;;  %1613 = vmatprep.subr.bf16.mxu1 %v2469_v1 }
 0x364   :  { %935 = vmatpush1.bf16.msra.mxu0 %v2028_v40  ;;  %1614 = vmatpush3.bf16.msra.mxu1 %v2058_v46 }
 0x365   :  { %1029 = vmatprep.subr.bf16.mxu0 %v1950_v10  ;;  %1619 = vmatprep.subr.bf16.mxu1 %v2469_v1 }
 0x407   :  { %v845_v8 = vpop.f32.mrf.mxu0  ;;  %v886_v54 = vpop.f32.mrf.mxu1 }
 0x408   :  { %v846_v48 = vadd.f32 %v845_v8, %v2156_v58  ;;  %v887_v62 = vadd.f32 %v886_v54, %v2166_v59 }
 0x409   :  { %v847_v50 = vpop.f32.mrf.mxu0  ;;  %v1597_v18 = vpop.f32.mrf.mxu1 }
 0x40a   :  { %v898_v21 = vadd.f32 %v846_v48, %v2114_v5  ;;  %v848_v43 = vadd.f32 %v847_v50, %v2161_v6 }
 0x40b   :  { %v849_v53 = vpop.f32.mrf.mxu0  ;;  %v889_v56 = vpop.f32.mrf.mxu1 }
 0x40c   :  { %v1419_v3 = vmul.f32 -1.442695, %v898_v21  ;;  %v905_v7 = vadd.f32 %v848_v43, %v2119_v9 }
 0x40d   :  { %v850_v4 = vpop.f32.mrf.mxu0  ;;  %v1598_v47 = vpop.f32.mrf.mxu1 }
 0x40e   :  { %1764 = vpow2.f32 %v1419_v3  ;;  %v1420_v27 = vmul.f32 -1.442695, %v905_v7 }
 0x410   :  { %1766 = vpow2.f32 %v1420_v27 }
 0x41b   :  { %v1765_v57 = vpop.eup %1764 }
 0x41c   :  { %v902_v31 = vadd.f32 1.0, %v1765_v57 }
 0x41d   :  { %v1767_v15 = vpop.eup %1766 }
 0x41e   :  { %1768 = vrcp.f32 %v902_v31  ;;  %v909_v41 = vadd.f32 1.0, %v1767_v15 }
 0x420   :  { %1770 = vrcp.f32 %v909_v41 }
 0x42b   :  { %v1769_v5 = vpop.eup %1768 }
 0x42c   :  { %v912_v49 = vmul.f32 %v1769_v5, %v887_v62  ;;  %v2359_v62 = vld [vmem:[#allocation6 + $0xa8] ss:$12 sps:$4 sm:$0xff]   ;;  %v2370_v5 = vld [vmem:[#allocation6 + $0x90] ss:$12 sps:$4 sm:$0xff]  }
 0x42d   :  { %v1771_v51 = vpop.eup %1770 }
 0x42e   :  { %v913_v61 = vadd.f32 %v912_v49, %v2124_v23  ;;  %v915_v60 = vsub.f32 1.0, %v1771_v51  ;;  %v917_v9 = vmul.f32 %v1771_v51, %v2263_v55  ;;  %v2374_v49 = vld [vmem:[#allocation6 + $0x7c] ss:$12 sps:$4 sm:$0xff]  }
 0x430   :  { %1772 = vtanh.f32 %v913_v61  ;;  %v2382_v61 = vld [vmem:[#allocation6 + $0x64] ss:$12 sps:$4 sm:$0xff]  }
 0x43d   :  { %v1773_v0 = vpop.eup %1772 }
 0x43e   :  { %v916_v32 = vmul.f32 %v1773_v0, %v915_v60 }
 0x440   :  { %v2309_v2 = vadd.f32 %v917_v9, %v916_v32 }
 0x442   :  { %v919_v52 = vpack.c.bf16 %v2309_v2, %v2309_v2 }
 0x444   :  { %953 = vmatmul.mubr.bf16.vlgmr.msra.gmra.mxu0 %v919_v52  ;;  %1616 = vmatmul.mubr.bf16.vlgmr.msra.gmra.mxu1 %v919_v52  ;;  %v2472_v52 = vld [vmem:[#allocation15_spill] sm:$0xff] }
 0x445   :  { %1030 = vmatpush1.bf16.msra.mxu0 %v1953_v11  ;;  %1620 = vmatpush3.bf16.msra.mxu1 %v1986_v26 }
 0x446   :  { %1031 = vmatprep.subr.bf16.mxu0 %v1956_v12  ;;  %1621 = vmatprep.subr.bf16.mxu1 %v2469_v1 }
 0x447   :  { %1061 = vmatprep.mubr.bf16.mxu0 %v2470_v14  ;;  %1635 = vmatprep.mubr.msk.bf16.mxu1 %vm1888_vm2, %v2469_v1 }
 0x449   :  { %1032 = vmatpush1.bf16.msra.mxu0 %v1958_v13  ;;  %1622 = vmatpush3.bf16.msra.mxu1 %v1997_v30 }
 0x44a   :  { %1033 = vmatprep.subr.bf16.mxu0 %v1964_v16  ;;  %1623 = vmatprep.subr.bf16.mxu1 %v2469_v1 }
 0x44d   :  { %1034 = vmatpush1.bf16.msra.mxu0 %v1970_v19  ;;  %1624 = vmatpush3.bf16.msra.mxu1 %v2010_v35 }
 0x44e   :  { %1035 = vmatprep.subr.bf16.mxu0 %v1973_v20  ;;  %1625 = vmatprep.subr.bf16.mxu1 %v2469_v1 }
 0x451   :  { %1036 = vmatpush1.bf16.msra.mxu0 %v1978_v22  ;;  %1626 = vmatpush3.bf16.msra.mxu1 %v2021_v39 }
 0x452   :  { %1037 = vmatprep.subr.bf16.mxu0 %v1983_v25  ;;  %1627 = vmatprep.subr.bf16.mxu1 %v2469_v1 }
 0x455   :  { %1038 = vmatpush1.bf16.msra.mxu0 %v1989_v28  ;;  %1628 = vmatpush3.bf16.msra.mxu1 %v2038_v42 }
 0x456   :  { %1039 = vmatprep.subr.bf16.mxu0 %v1992_v29  ;;  %1629 = vmatprep.subr.bf16.mxu1 %v2469_v1 }
 0x459   :  { %1040 = vmatpush1.bf16.msra.mxu0 %v2003_v33  ;;  %1630 = vmatpush3.bf16.msra.mxu1 %v2045_v44 }
 0x45a   :  { %1041 = vmatprep.subr.bf16.mxu0 %v2007_v34  ;;  %1631 = vmatprep.subr.bf16.mxu1 %v2469_v1 }
 0x45d   :  { %1042 = vmatpush1.bf16.msra.mxu0 %v2014_v37  ;;  %1632 = vmatpush3.bf16.msra.mxu1 %v2052_v45 }
 0x45e   :  { %1043 = vmatprep.subr.bf16.mxu0 %v2018_v38  ;;  %1633 = vmatprep.subr.bf16.mxu1 %v2469_v1 }
 0x461   :  { %1044 = vmatpush1.bf16.msra.mxu0 %v2028_v40  ;;  %1634 = vmatpush3.bf16.msra.mxu1 %v2058_v46 }
 0x462   :  { %1138 = vmatprep.subr.bf16.mxu0 %v1950_v10  ;;  %1639 = vmatprep.subr.bf16.mxu1 %v2469_v1 }
 0x504   :  { %v954_v11 = vpop.f32.mrf.mxu0  ;;  %v995_v12 = vpop.f32.mrf.mxu1 }
 0x505   :  { %v955_v13 = vadd.f32 %v954_v11, %v2156_v58  ;;  %v996_v43 = vadd.f32 %v995_v12, %v2166_v59 }
 0x506   :  { %v956_v16 = vpop.f32.mrf.mxu0  ;;  %v1617_v19 = vpop.f32.mrf.mxu1 }
 0x507   :  { %v1007_v20 = vadd.f32 %v955_v13, %v2121_v17  ;;  %v957_v54 = vadd.f32 %v956_v16, %v2161_v6 }
 0x508   :  { %v958_v23 = vpop.f32.mrf.mxu0  ;;  %v998_v55 = vpop.f32.mrf.mxu1 }
 0x509   :  { %v1421_v8 = vmul.f32 -1.442695, %v1007_v20  ;;  %v1014_v10 = vadd.f32 %v957_v54, %v2126_v24  ;;  %v1822_v54 = vld [vmem:[#allocation6 + $0x98] ss:$12 sps:$4 sm:$0xff]  }
 0x50a   :  { %v959_v48 = vpop.f32.mrf.mxu0  ;;  %v1618_v50 = vpop.f32.mrf.mxu1 }
 0x50b   :  { %1774 = vpow2.f32 %v1421_v8  ;;  %v1422_v18 = vmul.f32 -1.442695, %v1014_v10  ;;  %v1821_v8 = vld [vmem:[#allocation6 + $0xb0] ss:$12 sps:$4 sm:$0xff]   ;;  %v1823_v48 = vld [vmem:[#allocation6 + $0x80] ss:$12 sps:$4 sm:$0xff]  }
 0x50c   :  { %v1825_v50 = vld [vmem:[#allocation6 + $0x68] ss:$12 sps:$4 sm:$0xff]   ;;  %v1826_v10 = vld [vmem:[#allocation6 + $0x4c] ss:$12 sps:$4 sm:$0xff]  }
 0x50d   :  { %1776 = vpow2.f32 %v1422_v18  ;;  %v1827_v18 = vld [vmem:[#allocation6 + $0x48] ss:$12 sps:$4 sm:$0xff]  }
 0x518   :  { %v1775_v21 = vpop.eup %1774 }
 0x519   :  { %v1011_v53 = vadd.f32 1.0, %v1775_v21  ;;  %v1828_v21 = vld [vmem:[#allocation6 + $0x50] ss:$12 sps:$4 sm:$0xff]  }
 0x51a   :  { %v1777_v56 = vpop.eup %1776 }
 0x51b   :  { %1778 = vrcp.f32 %v1011_v53  ;;  %v1018_v3 = vadd.f32 1.0, %v1777_v56  ;;  %v1829_v53 = vld [vmem:[#allocation6 + $0x34] ss:$12 sps:$4 sm:$0xff]   ;;  %v1830_v56 = vld [vmem:[#allocation6 + $0x30] ss:$12 sps:$4 sm:$0xff]  }
 0x51d   :  { %1780 = vrcp.f32 %v1018_v3  ;;  %v1831_v3 = vld [vmem:[#allocation6 + $0x38] ss:$12 sps:$4 sm:$0xff]  }
 0x528   :  { %v1779_v17 = vpop.eup %1778 }
 0x529   :  { %v1021_v4 = vmul.f32 %v1779_v17, %v996_v43  ;;  %v1832_v43 = vld [vmem:[#allocation6 + $0x1c] ss:$12 sps:$4 sm:$0xff]   ;;  %v1833_v17 = vld [vmem:[#allocation6 + $0x18] ss:$12 sps:$4 sm:$0xff]  }
 0x52a   :  { %v1781_v7 = vpop.eup %1780 }
 0x52b   :  { %v1022_v47 = vadd.f32 %v1021_v4, %v2139_v63  ;;  %v1024_v27 = vsub.f32 1.0, %v1781_v7  ;;  %v1026_v24 = vmul.f32 %v1781_v7, %v2309_v2  ;;  %v2363_v63 = vld [vmem:[#allocation6 + $0x94] ss:$12 sps:$4 sm:$0xff]  }
 0x52c   :  { %v1834_v4 = vld [vmem:[#allocation6 + $0x20] ss:$12 sps:$4 sm:$0xff]  }
 0x52d   :  { %1782 = vtanh.f32 %v1022_v47  ;;  %v1835_v47 = vld [vmem:[#allocation6 + $0x4] ss:$12 sps:$4 sm:$0xff]   ;;  %v1836_v7 = vld [vmem:[#allocation6] ss:$12 sps:$4 sm:$0xff]  }
 0x53a   :  { %v1783_v57 = vpop.eup %1782 }
 0x53b   :  { %v1025_v31 = vmul.f32 %v1783_v57, %v1024_v27  ;;  %v1837_v27 = vld [vmem:[#allocation6 + $0x8] ss:$12 sps:$4 sm:$0xff]  }
 0x53d   :  { %v2355_v15 = vadd.f32 %v1026_v24, %v1025_v31 }
 0x53f   :  { %v1028_v41 = vpack.c.bf16 %v2355_v15, %v2355_v15 }
 0x541   :  { %1062 = vmatmul.mubr.bf16.vlgmr.msra.gmra.mxu0 %v1028_v41  ;;  %1636 = vmatmul.mubr.bf16.vlgmr.msra.gmra.mxu1 %v1028_v41 }
 0x542   :  { %1139 = vmatpush1.bf16.msra.mxu0 %v2359_v62  ;;  %1640 = vmatpush3.bf16.msra.mxu1 %v1986_v26  ;;  %v2378_v26 = vld [vmem:[#allocation6 + $0x78] ss:$12 sps:$4 sm:$0xff]  }
 0x543   :  { %1140 = vmatprep.subr.bf16.mxu0 %v2363_v63  ;;  %1641 = vmatprep.subr.bf16.mxu1 %v2469_v1 }
 0x544   :  { %1170 = vmatprep.mubr.bf16.mxu0 %v2470_v14  ;;  %1655 = vmatprep.mubr.msk.bf16.mxu1 %vm1888_vm2, %v2469_v1 }
 0x546   :  { %1141 = vmatpush1.bf16.msra.mxu0 %v2370_v5  ;;  %1642 = vmatpush3.bf16.msra.mxu1 %v1997_v30 }
 0x547   :  { %1142 = vmatprep.subr.bf16.mxu0 %v2374_v49  ;;  %1643 = vmatprep.subr.bf16.mxu1 %v2469_v1 }
 0x54a   :  { %1143 = vmatpush1.bf16.msra.mxu0 %v2378_v26  ;;  %1644 = vmatpush3.bf16.msra.mxu1 %v2010_v35 }
 0x54b   :  { %1144 = vmatprep.subr.bf16.mxu0 %v2382_v61  ;;  %1645 = vmatprep.subr.bf16.mxu1 %v2469_v1 }
 0x54e   :  { %1145 = vmatpush1.bf16.msra.mxu0 %v1978_v22  ;;  %1646 = vmatpush3.bf16.msra.mxu1 %v2021_v39  ;;  %v1820_v22 = vld [vmem:[#allocation6 + $0xac] ss:$12 sps:$4 sm:$0xff]  }
 0x54f   :  { %1146 = vmatprep.subr.bf16.mxu0 %v1983_v25  ;;  %1647 = vmatprep.subr.bf16.mxu1 %v2469_v1 }
 0x552   :  { %1147 = vmatpush1.bf16.msra.mxu0 %v1989_v28  ;;  %1648 = vmatpush3.bf16.msra.mxu1 %v2038_v42 }
 0x553   :  { %1148 = vmatprep.subr.bf16.mxu0 %v1992_v29  ;;  %1649 = vmatprep.subr.bf16.mxu1 %v2469_v1 }
 0x556   :  { %1149 = vmatpush1.bf16.msra.mxu0 %v2003_v33  ;;  %1650 = vmatpush3.bf16.msra.mxu1 %v2045_v44  ;;  %v2471_v44 = vld [vmem:[#allocation11_spill] sm:$0xff] }
 0x557   :  { %1150 = vmatprep.subr.bf16.mxu0 %v2007_v34  ;;  %1651 = vmatprep.subr.bf16.mxu1 %v2469_v1 }
 0x55a   :  { %1151 = vmatpush1.bf16.msra.mxu0 %v2014_v37  ;;  %1652 = vmatpush3.bf16.msra.mxu1 %v2052_v45 }
 0x55b   :  { %1152 = vmatprep.subr.bf16.mxu0 %v2018_v38  ;;  %1653 = vmatprep.subr.bf16.mxu1 %v2469_v1 }
 0x55e   :  { %1153 = vmatpush1.bf16.msra.mxu0 %v2028_v40  ;;  %1654 = vmatpush3.bf16.msra.mxu1 %v2058_v46 }
 0x55f   :  { %1247 = vmatprep.subr.bf16.mxu0 %v1820_v22  ;;  %1659 = vmatprep.subr.bf16.mxu1 %v2469_v1 }
 0x601   :  { %v1063_v25 = vpop.f32.mrf.mxu0  ;;  %v1104_v28 = vpop.f32.mrf.mxu1 }
 0x602   :  { %v1064_v29 = vadd.f32 %v1063_v25, %v2156_v58  ;;  %v1105_v9 = vadd.f32 %v1104_v28, %v2166_v59 }
 0x603   :  { %v1065_v30 = vpop.f32.mrf.mxu0  ;;  %v1637_v33 = vpop.f32.mrf.mxu1 }
 0x604   :  { %v1116_v34 = vadd.f32 %v1064_v29, %v2131_v36  ;;  %v1066_v39 = vadd.f32 %v1065_v30, %v2161_v6 }
 0x605   :  { %v1067_v35 = vpop.f32.mrf.mxu0  ;;  %v1107_v37 = vpop.f32.mrf.mxu1 }
 0x606   :  { %v1423_v38 = vmul.f32 -1.442695, %v1116_v34  ;;  %v1123_v45 = vadd.f32 %v1066_v39, %v2471_v44 }
 0x607   :  { %v1068_v40 = vpop.f32.mrf.mxu0  ;;  %v1638_v42 = vpop.f32.mrf.mxu1 }
 0x608   :  { %1784 = vpow2.f32 %v1423_v38  ;;  %v1424_v46 = vmul.f32 -1.442695, %v1123_v45  ;;  %v2475_v40 = vld [vmem:[#allocation10_spill] sm:$0xff] }
 0x60a   :  { %1786 = vpow2.f32 %v1424_v46 }
 0x615   :  { %v1785_v51 = vpop.eup %1784 }
 0x616   :  { %v1120_v60 = vadd.f32 1.0, %v1785_v51 }
 0x617   :  { %v1787_v0 = vpop.eup %1786 }
 0x618   :  { %1788 = vrcp.f32 %v1120_v60  ;;  %v1127_v32 = vadd.f32 1.0, %v1787_v0 }
 0x61a   :  { %1790 = vrcp.f32 %v1127_v32 }
 0x625   :  { %v1789_v36 = vpop.eup %1788 }
 0x626   :  { %v1130_v2 = vmul.f32 %v1789_v36, %v1105_v9 }
 0x627   :  { %v1791_v12 = vpop.eup %1790 }
 0x628   :  { %v1131_v11 = vadd.f32 %v1130_v2, %v2472_v52  ;;  %v1133_v13 = vsub.f32 1.0, %v1791_v12  ;;  %v1135_v20 = vmul.f32 %v1791_v12, %v2355_v15  ;;  %v2476_v12 = vld [vmem:[#allocation16_spill] sm:$0xff] }
 0x62a   :  { %1792 = vtanh.f32 %v1131_v11 }
 0x637   :  { %v1793_v16 = vpop.eup %1792 }
 0x638   :  { %v1134_v19 = vmul.f32 %v1793_v16, %v1133_v13 }
 0x63a   :  { %v2412_v23 = vadd.f32 %v1135_v20, %v1134_v19 }
 0x63c   :  { %v1137_v55 = vpack.c.bf16 %v2412_v23, %v2412_v23 }
 0x63e   :  { %1171 = vmatmul.mubr.bf16.vlgmr.msra.gmra.mxu0 %v1137_v55  ;;  %1656 = vmatmul.mubr.bf16.vlgmr.msra.gmra.mxu1 %v1137_v55 }
 0x63f   :  { %1248 = vmatpush1.bf16.msra.mxu0 %v2359_v62  ;;  %1660 = vmatpush3.bf16.msra.mxu1 %v1821_v8  ;;  %v2473_v62 = vld [vmem:[#allocation12_spill] sm:$0xff] }
 0x640   :  { %1249 = vmatprep.subr.bf16.mxu0 %v2363_v63  ;;  %1661 = vmatprep.subr.bf16.mxu1 %v2469_v1 }
 0x641   :  { %1279 = vmatprep.mubr.bf16.mxu0 %v2470_v14  ;;  %1675 = vmatprep.mubr.msk.bf16.mxu1 %vm1888_vm2, %v2469_v1  ;;  %v1824_v14 = vld [vmem:[#allocation6 + $0x60] ss:$12 sps:$4 sm:$0xff]  }
 0x643   :  { %1250 = vmatpush1.bf16.msra.mxu0 %v2370_v5  ;;  %1662 = vmatpush3.bf16.msra.mxu1 %v1822_v54 }
 0x644   :  { %1251 = vmatprep.subr.bf16.mxu0 %v2374_v49  ;;  %1663 = vmatprep.subr.bf16.mxu1 %v2469_v1 }
 0x647   :  { %1252 = vmatpush1.bf16.msra.mxu0 %v2378_v26  ;;  %1664 = vmatpush3.bf16.msra.mxu1 %v1823_v48 }
 0x648   :  { %1253 = vmatprep.subr.bf16.mxu0 %v2382_v61  ;;  %1665 = vmatprep.subr.bf16.mxu1 %v2469_v1 }
 0x64b   :  { %1254 = vmatpush1.bf16.msra.mxu0 %v1824_v14  ;;  %1666 = vmatpush3.bf16.msra.mxu1 %v1825_v50 }
 0x64c   :  { %1255 = vmatprep.subr.bf16.mxu0 %v1826_v10  ;;  %1667 = vmatprep.subr.bf16.mxu1 %v2469_v1 }
 0x64f   :  { %1256 = vmatpush1.bf16.msra.mxu0 %v1827_v18  ;;  %1668 = vmatpush3.bf16.msra.mxu1 %v1828_v21 }
 0x650   :  { %1257 = vmatprep.subr.bf16.mxu0 %v1829_v53  ;;  %1669 = vmatprep.subr.bf16.mxu1 %v2469_v1 }
 0x653   :  { %1258 = vmatpush1.bf16.msra.mxu0 %v1830_v56  ;;  %1670 = vmatpush3.bf16.msra.mxu1 %v1831_v3  ;;  %v2478_v3 = vld [vmem:[#allocation13_spill] sm:$0xff] }
 0x654   :  { %1259 = vmatprep.subr.bf16.mxu0 %v1832_v43  ;;  %1671 = vmatprep.subr.bf16.mxu1 %v2469_v1 }
 0x657   :  { %1260 = vmatpush1.bf16.msra.mxu0 %v1833_v17  ;;  %1672 = vmatpush3.bf16.msra.mxu1 %v1834_v4 }
 0x658   :  { %1261 = vmatprep.subr.bf16.mxu0 %v1835_v47  ;;  %1673 = vmatprep.subr.bf16.mxu1 %v2469_v1  ;;  %v2474_v1 = vld [vmem:[#allocation14_spill] sm:$0xff] }
 0x65b   :  { %1262 = vmatpush1.bf16.msra.mxu0 %v1836_v7  ;;  %1674 = vmatpush3.bf16.msra.mxu1 %v1837_v27 }
 0x6fe   :  { %v1172_v57 = vpop.f32.mrf.mxu0  ;;  %v1213_v31 = vpop.f32.mrf.mxu1 }
 0x6ff   :  { %v1173_v24 = vadd.f32 %v1172_v57, %v2156_v58  ;;  %v1214_v37 = vadd.f32 %v1213_v31, %v2166_v59 }
 0x700   :  { %v1174_v15 = vpop.f32.mrf.mxu0  ;;  %v1657_v41 = vpop.f32.mrf.mxu1 }
 0x701   :  { %v1225_v63 = vadd.f32 %v1173_v24, %v2473_v62  ;;  %v1175_v61 = vadd.f32 %v1174_v15, %v2161_v6 }
 0x702   :  { %v1176_v5 = vpop.f32.mrf.mxu0  ;;  %v1216_v49 = vpop.f32.mrf.mxu1 }
 0x703   :  { %v1425_v26 = vmul.f32 -1.442695, %v1225_v63  ;;  %v1232_v28 = vadd.f32 %v1175_v61, %v2474_v1 }
 0x704   :  { %v1177_v22 = vpop.f32.mrf.mxu0  ;;  %v1658_v25 = vpop.f32.mrf.mxu1 }
 0x705   :  { %1794 = vpow2.f32 %v1425_v26  ;;  %v1426_v29 = vmul.f32 -1.442695, %v1232_v28 }
 0x707   :  { %1796 = vpow2.f32 %v1426_v29 }
 0x712   :  { %v1795_v30 = vpop.eup %1794 }
 0x713   :  { %v1229_v33 = vadd.f32 1.0, %v1795_v30 }
 0x714   :  { %v1797_v34 = vpop.eup %1796 }
 0x715   :  { %1798 = vrcp.f32 %v1229_v33  ;;  %v1236_v35 = vadd.f32 1.0, %v1797_v34 }
 0x717   :  { %1800 = vrcp.f32 %v1236_v35 }
 0x722   :  { %v1799_v38 = vpop.eup %1798 }
 0x723   :  { %v1239_v39 = vmul.f32 %v1799_v38, %v1214_v37 }
 0x724   :  { %v1801_v44 = vpop.eup %1800 }
 0x725   :  { %v1240_v42 = vadd.f32 %v1239_v39, %v2475_v40  ;;  %v1242_v45 = vsub.f32 1.0, %v1801_v44  ;;  %v1244_v60 = vmul.f32 %v1801_v44, %v2412_v23  ;;  %v2477_v23 = vld [vmem:[#allocation17_spill] sm:$0xff] }
 0x727   :  { %1802 = vtanh.f32 %v1240_v42 }
 0x734   :  { %v1803_v46 = vpop.eup %1802 }
 0x735   :  { %v1243_v51 = vmul.f32 %v1803_v46, %v1242_v45 }
 0x737   :  { %v1245_v0 = vadd.f32 %v1244_v60, %v1243_v51 }
 0x739   :  { %v1246_v32 = vpack.c.bf16 %v1245_v0, %v1245_v0 }
 0x73b   :  { %1280 = vmatmul.mubr.bf16.vlgmr.msra.gmra.mxu0 %v1246_v32  ;;  %1676 = vmatmul.mubr.bf16.vlgmr.msra.gmra.mxu1 %v1246_v32 }
 0x7fb   :  { %v1281_v9 = vpop.f32.mrf.mxu0  ;;  %v1322_v36 = vpop.f32.mrf.mxu1 }
 0x7fc   :  { %v1282_v2 = vadd.f32 %v1281_v9, %v2156_v58  ;;  %v1323_v21 = vadd.f32 %v1322_v36, %v2166_v59 }
 0x7fd   :  { %v1283_v52 = vpop.f32.mrf.mxu0  ;;  %v1677_v11 = vpop.f32.mrf.mxu1 }
 0x7fe   :  { %v1334_v13 = vadd.f32 %v1282_v2, %v2476_v12  ;;  %v1284_v55 = vadd.f32 %v1283_v52, %v2161_v6 }
 0x7ff   :  { %v1285_v16 = vpop.f32.mrf.mxu0  ;;  %v1325_v19 = vpop.f32.mrf.mxu1 }
 0x800   :  { %v1427_v20 = vmul.f32 -1.442695, %v1334_v13  ;;  %v1341_v48 = vadd.f32 %v1284_v55, %v2477_v23 }
 0x801   :  { %v1286_v8 = vpop.f32.mrf.mxu0  ;;  %v1678_v54 = vpop.f32.mrf.mxu1 }
 0x802   :  { %1804 = vpow2.f32 %v1427_v20  ;;  %v1428_v14 = vmul.f32 -1.442695, %v1341_v48 }
 0x804   :  { %1806 = vpow2.f32 %v1428_v14 }
 0x80f   :  { %v1805_v50 = vpop.eup %1804 }
 0x810   :  { %v1338_v10 = vadd.f32 1.0, %v1805_v50 }
 0x811   :  { %v1807_v58 = vpop.eup %1806 }
 0x812   :  { %1808 = vrcp.f32 %v1338_v10  ;;  %v1345_v18 = vadd.f32 1.0, %v1807_v58 }
 0x814   :  { %1810 = vrcp.f32 %v1345_v18 }
 0x81f   :  { %v1809_v53 = vpop.eup %1808 }
 0x820   :  { %v1348_v56 = vmul.f32 %v1809_v53, %v1323_v21 }
 0x821   :  { %v1811_v6 = vpop.eup %1810 }
 0x822   :  { %v1349_v43 = vadd.f32 %v1348_v56, %v2478_v3  ;;  %v1351_v17 = vsub.f32 1.0, %v1811_v6  ;;  %v1353_v7 = vmul.f32 %v1811_v6, %v1245_v0 }
 0x824   :  { %1812 = vtanh.f32 %v1349_v43 }
 0x831   :  { %v1813_v4 = vpop.eup %1812 }
 0x832   :  { %v1352_v47 = vmul.f32 %v1813_v4, %v1351_v17 }
 0x834   :  { %v1354_v27 = vadd.f32 %v1353_v7, %v1352_v47 }
 0x836   :  { %1355 = vst [vmem:[%s2454_s6] sm:$0xff] %v1354_v27 }
 0x837   :  { %1360 = vsyncpa [#allocation7], 1 }

</bundles_post_ra>
